<compile_context>
chip_gen: v7x
topology: tpu7x:2x2x1
jax: 0.10.0
libtpu: 0.0.40
codegen_flags: <defaults>
</compile_context>

<pallas_src>
import functools

import jax
import jax.numpy as jnp
from jax import lax
from jax.experimental import pallas as pl
from jax.experimental.pallas import tpu as pltpu


def _softplus(x):
    # numerically-safe softplus(x) = log(1 + exp(x))
    return jnp.where(x > 20.0, x, jnp.log1p(jnp.exp(jnp.minimum(x, 20.0))))


def _sde_kernel(
    # inputs (all whole arrays, resident in VMEM)
    x0_ref, dt_ref, noise_ref,
    w1s1_ref, b1sb1_ref,          # fused first layers of drift (w1) and diffusion (s1)
    w2_ref, b2_ref, w3_ref, b3_ref, w4_ref, b4_ref,
    s2_ref, sb2_ref,
    # outputs
    vals_ref,                     # (n_steps+1, B, D) — vals[0] == latents
    drifts_ref,                   # (n_steps,   B, D)
    diffs_ref,                    # (n_steps,   B, D)
):
    n_steps = drifts_ref.shape[0]
    H = w2_ref.shape[0]

    x0 = x0_ref[...]                       # (B, D) f32
    dt = dt_ref[...]                       # (B, 1) f32
    sqrt_dt = jnp.sqrt(dt)                 # hoisted: loop-invariant Brownian std

    # vals[0] = initial latents, written in-kernel (no wrapper concatenate).
    vals_ref[0] = x0

    # Load weights once; they stay live across the fully-unrolled loop.
    w1s1 = w1s1_ref[...]
    b1sb1 = b1sb1_ref[...]
    w2 = w2_ref[...]
    b2 = b2_ref[...]
    w3 = w3_ref[...]
    b3 = b3_ref[...]
    w4 = w4_ref[...]
    b4 = b4_ref[...]
    s2 = s2_ref[...]
    sb2 = sb2_ref[...]

    def step_fn(step, z):
        # ---- fused first layer: [drift_h | diff_s] = relu(z @ [w1 | s1] + [b1 | sb1]) ----
        hs = jnp.maximum(
            jnp.dot(z, w1s1, preferred_element_type=jnp.float32) + b1sb1, 0.0)
        h = hs[:, :H]                      # drift branch hidden
        s = hs[:, H:]                      # diffusion branch hidden

        # ---- drift mu(z): remaining Linear->ReLU->Linear->ReLU->Linear ----
        h = jnp.maximum(
            jnp.dot(h, w2, preferred_element_type=jnp.float32) + b2, 0.0)
        h = jnp.maximum(
            jnp.dot(h, w3, preferred_element_type=jnp.float32) + b3, 0.0)
        drift = jnp.dot(h, w4, preferred_element_type=jnp.float32) + b4

        # ---- diffusion sigma(z): remaining Linear->Softplus, then + 0.01 ----
        diffusion = _softplus(
            jnp.dot(s, s2, preferred_element_type=jnp.float32) + sb2) + 0.01

        # ---- Euler–Maruyama update: dw = N(0,1) * sqrt(dt), shape (B,1) broadcast over D ----
        dw = noise_ref[step] * sqrt_dt     # (B, 1)
        z_next = z + drift * dt + diffusion * dw

        vals_ref[step + 1] = z_next
        drifts_ref[step] = drift
        diffs_ref[step] = diffusion
        return z_next

    # Fully unrolled — n_steps is small & static; state z carried in registers.
    lax.fori_loop(0, n_steps, step_fn, x0, unroll=True)


def init_params(key, latent_dim, hidden_size):
    """Deterministic PyTorch-style Linear init; weights stored as (in, out)."""
    def linear(k, fan_in, fan_out):
        kw, kb = jax.random.split(k)
        bound = 1.0 / jnp.sqrt(fan_in)
        w = jax.random.uniform(kw, (fan_in, fan_out), jnp.float32, -bound, bound)
        b = jax.random.uniform(kb, (1, fan_out), jnp.float32, -bound, bound)
        return w, b

    keys = jax.random.split(key, 6)
    w1, b1 = linear(keys[0], latent_dim, hidden_size)
    w2, b2 = linear(keys[1], hidden_size, hidden_size)
    w3, b3 = linear(keys[2], hidden_size, hidden_size)
    w4, b4 = linear(keys[3], hidden_size, latent_dim)
    s1, sb1 = linear(keys[4], latent_dim, hidden_size)
    s2, sb2 = linear(keys[5], hidden_size, latent_dim)
    return dict(w1=w1, b1=b1, w2=w2, b2=b2, w3=w3, b3=b3, w4=w4, b4=b4,
                s1=s1, sb1=sb1, s2=s2, sb2=sb2)


@functools.partial(jax.jit, static_argnames=("n_euler_steps",))
def sde_transition_forward(latents, start_times, dt, noise, params, n_euler_steps):
    """
    Pallas implementation of SDETransitionTimeIndep.forward (== sdeint, Euler–Maruyama).
    Returns (vals, drifts, diffusions):
      vals       : (n_steps+1, B, D)  (vals[0] == latents)
      drifts     : (n_steps,  B, D)
      diffusions : (n_steps,  B, D)
    `start_times` is accepted for API parity; drift/diffusion are time-independent.
    """
    del start_times
    B, D = latents.shape
    n = n_euler_steps

    # Fuse drift/diffusion first layers (shared input z) into one (D, 2H) weight.
    w1s1 = jnp.concatenate([params["w1"], params["s1"]], axis=1)
    b1sb1 = jnp.concatenate([params["b1"], params["sb1"]], axis=1)

    vmem_spec = lambda: pl.BlockSpec(memory_space=pltpu.MemorySpace.VMEM)

    out_shapes = (
        jax.ShapeDtypeStruct((n + 1, B, D), jnp.float32),   # vals (incl. initial latents)
        jax.ShapeDtypeStruct((n, B, D), jnp.float32),       # drifts
        jax.ShapeDtypeStruct((n, B, D), jnp.float32),       # diffusions
    )

    vals, drifts, diffusions = pl.pallas_call(
        _sde_kernel,
        out_shape=out_shapes,
        in_specs=[vmem_spec() for _ in range(13)],
        out_specs=tuple(vmem_spec() for _ in range(3)),
        # NOTE: no grid — single kernel invocation; the sequential Euler loop lives
        # entirely inside the kernel (no per-step pipeline / DMA overhead).
        # TODO(synk): if B grows to hundreds of rows, add a batch-tiled "parallel" grid
        # axis so v7x's second TensorCore takes half the batch; not worth it at B=8.
    )(
        latents.astype(jnp.float32),
        dt.astype(jnp.float32),
        noise.astype(jnp.float32),
        w1s1, b1sb1,
        params["w2"], params["b2"],
        params["w3"], params["b3"],
        params["w4"], params["b4"],
        params["s2"], params["sb2"],
    )
    return vals, drifts, diffusions


def _reference_forward(latents, dt, noise, params, n_steps):
    """Pure-JAX reference of sdeint with the same parameters / noise stream (unfused weights)."""
    def mu(z):
        h = jax.nn.relu(z @ params["w1"] + params["b1"])
        h = jax.nn.relu(h @ params["w2"] + params["b2"])
        h = jax.nn.relu(h @ params["w3"] + params["b3"])
        return h @ params["w4"] + params["b4"]

    def sigma(z):
        s = jax.nn.relu(z @ params["s1"] + params["sb1"])
        return jax.nn.softplus(s @ params["s2"] + params["sb2"]) + 0.01

    z = latents
    vals, drifts, diffs = [z], [], []
    for i in range(n_steps):
        dw = noise[i] * jnp.sqrt(dt)
        f = mu(z)
        g = sigma(z)
        z = z + f * dt + g * dw
        vals.append(z); drifts.append(f); diffs.append(g)
    return jnp.stack(vals), jnp.stack(drifts), jnp.stack(diffs)


if __name__ == "__main__":
    B, LATENT, HIDDEN, N_STEPS = 8, 16, 32, 10

    key = jax.random.PRNGKey(0)
    k_param, k_x, k_t, k_dt, k_noise = jax.random.split(key, 5)

    params = init_params(k_param, LATENT, HIDDEN)
    latents = jax.random.normal(k_x, (B, LATENT), jnp.float32)
    start_times = jax.random.uniform(k_t, (B, 1), jnp.float32)
    dt = 0.05 + 0.05 * jax.random.uniform(k_dt, (B, 1), jnp.float32)
    # Brownian increments: dw = N(0,1) * sqrt(dt); shape (B, 1), broadcast over latent_dim
    # (matches torch.normal(zeros(dt.shape), sqrt(dt)) in sdeint).
    noise = jax.random.normal(k_noise, (N_STEPS, B, 1), jnp.float32)

    vals, drifts, diffusions = sde_transition_forward(
        latents, start_times, dt, noise, params, N_STEPS)
    jax.block_until_ready((vals, drifts, diffusions))

    # correctness check against pure-JAX reference
    ref_vals, ref_drifts, ref_diffs = _reference_forward(latents, dt, noise, params, N_STEPS)
    assert jnp.allclose(vals, ref_vals, atol=1e-5, rtol=1e-5)
    assert jnp.allclose(drifts, ref_drifts, atol=1e-5, rtol=1e-5)
    assert jnp.allclose(diffusions, ref_diffs, atol=1e-5, rtol=1e-5)

    print("KERNEL_OK")
</pallas_src>

<mosaic_0001>
module attributes {stable_mosaic.version = 11 : i64} {
  func.func @_sde_kernel(%arg0: memref<8x16xf32, #tpu.memory_space<vmem>>, %arg1: memref<8x1xf32, #tpu.memory_space<vmem>>, %arg2: memref<10x8x1xf32, #tpu.memory_space<vmem>>, %arg3: memref<16x64xf32, #tpu.memory_space<vmem>>, %arg4: memref<1x64xf32, #tpu.memory_space<vmem>>, %arg5: memref<32x32xf32, #tpu.memory_space<vmem>>, %arg6: memref<1x32xf32, #tpu.memory_space<vmem>>, %arg7: memref<32x32xf32, #tpu.memory_space<vmem>>, %arg8: memref<1x32xf32, #tpu.memory_space<vmem>>, %arg9: memref<32x16xf32, #tpu.memory_space<vmem>>, %arg10: memref<1x16xf32, #tpu.memory_space<vmem>>, %arg11: memref<32x16xf32, #tpu.memory_space<vmem>>, %arg12: memref<1x16xf32, #tpu.memory_space<vmem>>, %arg13: memref<11x8x16xf32, #tpu.memory_space<vmem>>, %arg14: memref<10x8x16xf32, #tpu.memory_space<vmem>>, %arg15: memref<10x8x16xf32, #tpu.memory_space<vmem>>) attributes {dimension_semantics = [], scalar_prefetch = 0 : i64, scratch_operands = 0 : i64, tpu.core_type = #tpu.core_type<tc>} {
    %c0 = arith.constant 0 : index
    %c0_0 = arith.constant 0 : index
    %0 = vector.load %arg0[%c0, %c0_0] : memref<8x16xf32, #tpu.memory_space<vmem>>, vector<8x16xf32>
    %c0_1 = arith.constant 0 : index
    %c0_2 = arith.constant 0 : index
    %1 = vector.load %arg1[%c0_1, %c0_2] : memref<8x1xf32, #tpu.memory_space<vmem>>, vector<8x1xf32>
    %2 = math.sqrt %1 : vector<8x1xf32>
    %c0_3 = arith.constant 0 : index
    %c0_4 = arith.constant 0 : index
    %c0_5 = arith.constant 0 : index
    %3 = vector.load %arg13[%c0_3, %c0_4, %c0_5] : memref<11x8x16xf32, #tpu.memory_space<vmem>>, vector<1x8x16xf32>
    %4 = vector.shape_cast %3 : vector<1x8x16xf32> to vector<8x16xf32>
    %5 = vector.shape_cast %0 : vector<8x16xf32> to vector<1x8x16xf32>
    tpu.vector_store %arg13[%c0_3, %c0_4, %c0_5], %5 {strides = array<i32>} : memref<11x8x16xf32, #tpu.memory_space<vmem>>, vector<1x8x16xf32>,
    %c0_6 = arith.constant 0 : index
    %c0_7 = arith.constant 0 : index
    %6 = vector.load %arg3[%c0_6, %c0_7] : memref<16x64xf32, #tpu.memory_space<vmem>>, vector<16x64xf32>
    %c0_8 = arith.constant 0 : index
    %c0_9 = arith.constant 0 : index
    %7 = vector.load %arg4[%c0_8, %c0_9] : memref<1x64xf32, #tpu.memory_space<vmem>>, vector<1x64xf32>
    %c0_10 = arith.constant 0 : index
    %c0_11 = arith.constant 0 : index
    %8 = vector.load %arg5[%c0_10, %c0_11] : memref<32x32xf32, #tpu.memory_space<vmem>>, vector<32x32xf32>
    %c0_12 = arith.constant 0 : index
    %c0_13 = arith.constant 0 : index
    %9 = vector.load %arg6[%c0_12, %c0_13] : memref<1x32xf32, #tpu.memory_space<vmem>>, vector<1x32xf32>
    %c0_14 = arith.constant 0 : index
    %c0_15 = arith.constant 0 : index
    %10 = vector.load %arg7[%c0_14, %c0_15] : memref<32x32xf32, #tpu.memory_space<vmem>>, vector<32x32xf32>
    %c0_16 = arith.constant 0 : index
    %c0_17 = arith.constant 0 : index
    %11 = vector.load %arg8[%c0_16, %c0_17] : memref<1x32xf32, #tpu.memory_space<vmem>>, vector<1x32xf32>
    %c0_18 = arith.constant 0 : index
    %c0_19 = arith.constant 0 : index
    %12 = vector.load %arg9[%c0_18, %c0_19] : memref<32x16xf32, #tpu.memory_space<vmem>>, vector<32x16xf32>
    %c0_20 = arith.constant 0 : index
    %c0_21 = arith.constant 0 : index
    %13 = vector.load %arg10[%c0_20, %c0_21] : memref<1x16xf32, #tpu.memory_space<vmem>>, vector<1x16xf32>
    %c0_22 = arith.constant 0 : index
    %c0_23 = arith.constant 0 : index
    %14 = vector.load %arg11[%c0_22, %c0_23] : memref<32x16xf32, #tpu.memory_space<vmem>>, vector<32x16xf32>
    %c0_24 = arith.constant 0 : index
    %c0_25 = arith.constant 0 : index
    %15 = vector.load %arg12[%c0_24, %c0_25] : memref<1x16xf32, #tpu.memory_space<vmem>>, vector<1x16xf32>
    %c0_i32 = arith.constant 0 : i32
    %cst = arith.constant dense<0.000000e+00> : vector<8x64xf32>
    %16 = tpu.matmul %0, %6, %cst {dimension_numbers = #tpu.dot_dimension_numbers<[1], [0], [0], [1], [0, 0, 1, 1], [], []>} : vector<8x16xf32>, vector<16x64xf32>, vector<8x64xf32> -> vector<8x64xf32>
    %17 = vector.broadcast %7 : vector<1x64xf32> to vector<8x64xf32>
    %18 = arith.addf %16, %17 : vector<8x64xf32>
    %cst_26 = arith.constant 0.000000e+00 : f32
    %19 = vector.broadcast %cst_26 : f32 to vector<8x64xf32>
    %20 = arith.maximumf %18, %19 : vector<8x64xf32>
    %21 = vector.extract_strided_slice %20 {offsets = [0, 0], sizes = [8, 32], strides = [1, 1]} : vector<8x64xf32> to vector<8x32xf32>
    %22 = vector.extract_strided_slice %20 {offsets = [0, 32], sizes = [8, 32], strides = [1, 1]} : vector<8x64xf32> to vector<8x32xf32>
    %cst_27 = arith.constant dense<0.000000e+00> : vector<8x32xf32>
    %23 = tpu.matmul %21, %8, %cst_27 {dimension_numbers = #tpu.dot_dimension_numbers<[1], [0], [0], [1], [0, 0, 1, 1], [], []>} : vector<8x32xf32>, vector<32x32xf32>, vector<8x32xf32> -> vector<8x32xf32>
    %24 = vector.broadcast %9 : vector<1x32xf32> to vector<8x32xf32>
    %25 = arith.addf %23, %24 : vector<8x32xf32>
    %cst_28 = arith.constant 0.000000e+00 : f32
    %26 = vector.broadcast %cst_28 : f32 to vector<8x32xf32>
    %27 = arith.maximumf %25, %26 : vector<8x32xf32>
    %cst_29 = arith.constant dense<0.000000e+00> : vector<8x32xf32>
    %28 = tpu.matmul %27, %10, %cst_29 {dimension_numbers = #tpu.dot_dimension_numbers<[1], [0], [0], [1], [0, 0, 1, 1], [], []>} : vector<8x32xf32>, vector<32x32xf32>, vector<8x32xf32> -> vector<8x32xf32>
    %29 = vector.broadcast %11 : vector<1x32xf32> to vector<8x32xf32>
    %30 = arith.addf %28, %29 : vector<8x32xf32>
    %cst_30 = arith.constant 0.000000e+00 : f32
    %31 = vector.broadcast %cst_30 : f32 to vector<8x32xf32>
    %32 = arith.maximumf %30, %31 : vector<8x32xf32>
    %cst_31 = arith.constant dense<0.000000e+00> : vector<8x16xf32>
    %33 = tpu.matmul %32, %12, %cst_31 {dimension_numbers = #tpu.dot_dimension_numbers<[1], [0], [0], [1], [0, 0, 1, 1], [], []>} : vector<8x32xf32>, vector<32x16xf32>, vector<8x16xf32> -> vector<8x16xf32>
    %34 = vector.broadcast %13 : vector<1x16xf32> to vector<8x16xf32>
    %35 = arith.addf %33, %34 : vector<8x16xf32>
    %cst_32 = arith.constant dense<0.000000e+00> : vector<8x16xf32>
    %36 = tpu.matmul %22, %14, %cst_32 {dimension_numbers = #tpu.dot_dimension_numbers<[1], [0], [0], [1], [0, 0, 1, 1], [], []>} : vector<8x32xf32>, vector<32x16xf32>, vector<8x16xf32> -> vector<8x16xf32>
    %37 = vector.broadcast %15 : vector<1x16xf32> to vector<8x16xf32>
    %38 = arith.addf %36, %37 : vector<8x16xf32>
    %cst_33 = arith.constant 2.000000e+01 : f32
    %39 = vector.broadcast %cst_33 : f32 to vector<8x16xf32>
    %40 = arith.cmpf ogt, %38, %39 : vector<8x16xf32>
    %cst_34 = arith.constant 2.000000e+01 : f32
    %41 = vector.broadcast %cst_34 : f32 to vector<8x16xf32>
    %42 = arith.minimumf %38, %41 : vector<8x16xf32>
    %43 = math.exp %42 : vector<8x16xf32>
    %44 = math.log1p %43 : vector<8x16xf32>
    %45 = arith.select %40, %38, %44 : vector<8x16xi1>, vector<8x16xf32>
    %cst_35 = arith.constant 0.00999999977 : f32
    %46 = vector.broadcast %cst_35 : f32 to vector<8x16xf32>
    %47 = arith.addf %45, %46 : vector<8x16xf32>
    %48 = arith.index_cast %c0_i32 : i32 to index
    %c0_36 = arith.constant 0 : index
    %c0_37 = arith.constant 0 : index
    %49 = vector.load %arg2[%48, %c0_36, %c0_37] : memref<10x8x1xf32, #tpu.memory_space<vmem>>, vector<1x8x1xf32>
    %50 = vector.shape_cast %49 : vector<1x8x1xf32> to vector<8x1xf32>
    %51 = arith.mulf %50, %2 : vector<8x1xf32>
    %52 = vector.broadcast %1 : vector<8x1xf32> to vector<8x16xf32>
    %53 = arith.mulf %35, %52 : vector<8x16xf32>
    %54 = arith.addf %0, %53 : vector<8x16xf32>
    %55 = vector.broadcast %51 : vector<8x1xf32> to vector<8x16xf32>
    %56 = arith.mulf %47, %55 : vector<8x16xf32>
    %57 = arith.addf %54, %56 : vector<8x16xf32>
    %c1_i32 = arith.constant 1 : i32
    %58 = arith.addi %c0_i32, %c1_i32 : i32
    %59 = arith.index_cast %58 : i32 to index
    %c0_38 = arith.constant 0 : index
    %c0_39 = arith.constant 0 : index
    %60 = vector.load %arg13[%59, %c0_38, %c0_39] : memref<11x8x16xf32, #tpu.memory_space<vmem>>, vector<1x8x16xf32>
    %61 = vector.shape_cast %60 : vector<1x8x16xf32> to vector<8x16xf32>
    %62 = vector.shape_cast %57 : vector<8x16xf32> to vector<1x8x16xf32>
    tpu.vector_store %arg13[%59, %c0_38, %c0_39], %62 {strides = array<i32>} : memref<11x8x16xf32, #tpu.memory_space<vmem>>, vector<1x8x16xf32>,
    %63 = arith.index_cast %c0_i32 : i32 to index
    %c0_40 = arith.constant 0 : index
    %c0_41 = arith.constant 0 : index
    %64 = vector.load %arg14[%63, %c0_40, %c0_41] : memref<10x8x16xf32, #tpu.memory_space<vmem>>, vector<1x8x16xf32>
    %65 = vector.shape_cast %64 : vector<1x8x16xf32> to vector<8x16xf32>
    %66 = vector.shape_cast %35 : vector<8x16xf32> to vector<1x8x16xf32>
    tpu.vector_store %arg14[%63, %c0_40, %c0_41], %66 {strides = array<i32>} : memref<10x8x16xf32, #tpu.memory_space<vmem>>, vector<1x8x16xf32>,
    %67 = arith.index_cast %c0_i32 : i32 to index
    %c0_42 = arith.constant 0 : index
    %c0_43 = arith.constant 0 : index
    %68 = vector.load %arg15[%67, %c0_42, %c0_43] : memref<10x8x16xf32, #tpu.memory_space<vmem>>, vector<1x8x16xf32>
    %69 = vector.shape_cast %68 : vector<1x8x16xf32> to vector<8x16xf32>
    %70 = vector.shape_cast %47 : vector<8x16xf32> to vector<1x8x16xf32>
    tpu.vector_store %arg15[%67, %c0_42, %c0_43], %70 {strides = array<i32>} : memref<10x8x16xf32, #tpu.memory_space<vmem>>, vector<1x8x16xf32>,
    %c1_i32_44 = arith.constant 1 : i32
    %cst_45 = arith.constant dense<0.000000e+00> : vector<8x64xf32>
    %71 = tpu.matmul %57, %6, %cst_45 {dimension_numbers = #tpu.dot_dimension_numbers<[1], [0], [0], [1], [0, 0, 1, 1], [], []>} : vector<8x16xf32>, vector<16x64xf32>, vector<8x64xf32> -> vector<8x64xf32>
    %72 = vector.broadcast %7 : vector<1x64xf32> to vector<8x64xf32>
    %73 = arith.addf %71, %72 : vector<8x64xf32>
    %cst_46 = arith.constant 0.000000e+00 : f32
    %74 = vector.broadcast %cst_46 : f32 to vector<8x64xf32>
    %75 = arith.maximumf %73, %74 : vector<8x64xf32>
    %76 = vector.extract_strided_slice %75 {offsets = [0, 0], sizes = [8, 32], strides = [1, 1]} : vector<8x64xf32> to vector<8x32xf32>
    %77 = vector.extract_strided_slice %75 {offsets = [0, 32], sizes = [8, 32], strides = [1, 1]} : vector<8x64xf32> to vector<8x32xf32>
    %cst_47 = arith.constant dense<0.000000e+00> : vector<8x32xf32>
    %78 = tpu.matmul %76, %8, %cst_47 {dimension_numbers = #tpu.dot_dimension_numbers<[1], [0], [0], [1], [0, 0, 1, 1], [], []>} : vector<8x32xf32>, vector<32x32xf32>, vector<8x32xf32> -> vector<8x32xf32>
    %79 = vector.broadcast %9 : vector<1x32xf32> to vector<8x32xf32>
    %80 = arith.addf %78, %79 : vector<8x32xf32>
    %cst_48 = arith.constant 0.000000e+00 : f32
    %81 = vector.broadcast %cst_48 : f32 to vector<8x32xf32>
    %82 = arith.maximumf %80, %81 : vector<8x32xf32>
    %cst_49 = arith.constant dense<0.000000e+00> : vector<8x32xf32>
    %83 = tpu.matmul %82, %10, %cst_49 {dimension_numbers = #tpu.dot_dimension_numbers<[1], [0], [0], [1], [0, 0, 1, 1], [], []>} : vector<8x32xf32>, vector<32x32xf32>, vector<8x32xf32> -> vector<8x32xf32>
    %84 = vector.broadcast %11 : vector<1x32xf32> to vector<8x32xf32>
    %85 = arith.addf %83, %84 : vector<8x32xf32>
    %cst_50 = arith.constant 0.000000e+00 : f32
    %86 = vector.broadcast %cst_50 : f32 to vector<8x32xf32>
    %87 = arith.maximumf %85, %86 : vector<8x32xf32>
    %cst_51 = arith.constant dense<0.000000e+00> : vector<8x16xf32>
    %88 = tpu.matmul %87, %12, %cst_51 {dimension_numbers = #tpu.dot_dimension_numbers<[1], [0], [0], [1], [0, 0, 1, 1], [], []>} : vector<8x32xf32>, vector<32x16xf32>, vector<8x16xf32> -> vector<8x16xf32>
    %89 = vector.broadcast %13 : vector<1x16xf32> to vector<8x16xf32>
    %90 = arith.addf %88, %89 : vector<8x16xf32>
    %cst_52 = arith.constant dense<0.000000e+00> : vector<8x16xf32>
    %91 = tpu.matmul %77, %14, %cst_52 {dimension_numbers = #tpu.dot_dimension_numbers<[1], [0], [0], [1], [0, 0, 1, 1], [], []>} : vector<8x32xf32>, vector<32x16xf32>, vector<8x16xf32> -> vector<8x16xf32>
    %92 = vector.broadcast %15 : vector<1x16xf32> to vector<8x16xf32>
    %93 = arith.addf %91, %92 : vector<8x16xf32>
    %cst_53 = arith.constant 2.000000e+01 : f32
    %94 = vector.broadcast %cst_53 : f32 to vector<8x16xf32>
    %95 = arith.cmpf ogt, %93, %94 : vector<8x16xf32>
    %cst_54 = arith.constant 2.000000e+01 : f32
    %96 = vector.broadcast %cst_54 : f32 to vector<8x16xf32>
    %97 = arith.minimumf %93, %96 : vector<8x16xf32>
    %98 = math.exp %97 : vector<8x16xf32>
    %99 = math.log1p %98 : vector<8x16xf32>
    %100 = arith.select %95, %93, %99 : vector<8x16xi1>, vector<8x16xf32>
    %cst_55 = arith.constant 0.00999999977 : f32
    %101 = vector.broadcast %cst_55 : f32 to vector<8x16xf32>
    %102 = arith.addf %100, %101 : vector<8x16xf32>
    %103 = arith.index_cast %c1_i32_44 : i32 to index
    %c0_56 = arith.constant 0 : index
    %c0_57 = arith.constant 0 : index
    %104 = vector.load %arg2[%103, %c0_56, %c0_57] : memref<10x8x1xf32, #tpu.memory_space<vmem>>, vector<1x8x1xf32>
    %105 = vector.shape_cast %104 : vector<1x8x1xf32> to vector<8x1xf32>
    %106 = arith.mulf %105, %2 : vector<8x1xf32>
    %107 = vector.broadcast %1 : vector<8x1xf32> to vector<8x16xf32>
    %108 = arith.mulf %90, %107 : vector<8x16xf32>
    %109 = arith.addf %57, %108 : vector<8x16xf32>
    %110 = vector.broadcast %106 : vector<8x1xf32> to vector<8x16xf32>
    %111 = arith.mulf %102, %110 : vector<8x16xf32>
    %112 = arith.addf %109, %111 : vector<8x16xf32>
    %c1_i32_58 = arith.constant 1 : i32
    %113 = arith.addi %c1_i32_44, %c1_i32_58 : i32
    %114 = arith.index_cast %113 : i32 to index
    %c0_59 = arith.constant 0 : index
    %c0_60 = arith.constant 0 : index
    %115 = vector.load %arg13[%114, %c0_59, %c0_60] : memref<11x8x16xf32, #tpu.memory_space<vmem>>, vector<1x8x16xf32>
    %116 = vector.shape_cast %115 : vector<1x8x16xf32> to vector<8x16xf32>
    %117 = vector.shape_cast %112 : vector<8x16xf32> to vector<1x8x16xf32>
    tpu.vector_store %arg13[%114, %c0_59, %c0_60], %117 {strides = array<i32>} : memref<11x8x16xf32, #tpu.memory_space<vmem>>, vector<1x8x16xf32>,
    %118 = arith.index_cast %c1_i32_44 : i32 to index
    %c0_61 = arith.constant 0 : index
    %c0_62 = arith.constant 0 : index
    %119 = vector.load %arg14[%118, %c0_61, %c0_62] : memref<10x8x16xf32, #tpu.memory_space<vmem>>, vector<1x8x16xf32>
    %120 = vector.shape_cast %119 : vector<1x8x16xf32> to vector<8x16xf32>
    %121 = vector.shape_cast %90 : vector<8x16xf32> to vector<1x8x16xf32>
    tpu.vector_store %arg14[%118, %c0_61, %c0_62], %121 {strides = array<i32>} : memref<10x8x16xf32, #tpu.memory_space<vmem>>, vector<1x8x16xf32>,
    %122 = arith.index_cast %c1_i32_44 : i32 to index
    %c0_63 = arith.constant 0 : index
    %c0_64 = arith.constant 0 : index
    %123 = vector.load %arg15[%122, %c0_63, %c0_64] : memref<10x8x16xf32, #tpu.memory_space<vmem>>, vector<1x8x16xf32>
    %124 = vector.shape_cast %123 : vector<1x8x16xf32> to vector<8x16xf32>
    %125 = vector.shape_cast %102 : vector<8x16xf32> to vector<1x8x16xf32>
    tpu.vector_store %arg15[%122, %c0_63, %c0_64], %125 {strides = array<i32>} : memref<10x8x16xf32, #tpu.memory_space<vmem>>, vector<1x8x16xf32>,
    %c2_i32 = arith.constant 2 : i32
    %cst_65 = arith.constant dense<0.000000e+00> : vector<8x64xf32>
    %126 = tpu.matmul %112, %6, %cst_65 {dimension_numbers = #tpu.dot_dimension_numbers<[1], [0], [0], [1], [0, 0, 1, 1], [], []>} : vector<8x16xf32>, vector<16x64xf32>, vector<8x64xf32> -> vector<8x64xf32>
    %127 = vector.broadcast %7 : vector<1x64xf32> to vector<8x64xf32>
    %128 = arith.addf %126, %127 : vector<8x64xf32>
    %cst_66 = arith.constant 0.000000e+00 : f32
    %129 = vector.broadcast %cst_66 : f32 to vector<8x64xf32>
    %130 = arith.maximumf %128, %129 : vector<8x64xf32>
    %131 = vector.extract_strided_slice %130 {offsets = [0, 0], sizes = [8, 32], strides = [1, 1]} : vector<8x64xf32> to vector<8x32xf32>
    %132 = vector.extract_strided_slice %130 {offsets = [0, 32], sizes = [8, 32], strides = [1, 1]} : vector<8x64xf32> to vector<8x32xf32>
    %cst_67 = arith.constant dense<0.000000e+00> : vector<8x32xf32>
    %133 = tpu.matmul %131, %8, %cst_67 {dimension_numbers = #tpu.dot_dimension_numbers<[1], [0], [0], [1], [0, 0, 1, 1], [], []>} : vector<8x32xf32>, vector<32x32xf32>, vector<8x32xf32> -> vector<8x32xf32>
    %134 = vector.broadcast %9 : vector<1x32xf32> to vector<8x32xf32>
    %135 = arith.addf %133, %134 : vector<8x32xf32>
    %cst_68 = arith.constant 0.000000e+00 : f32
    %136 = vector.broadcast %cst_68 : f32 to vector<8x32xf32>
    %137 = arith.maximumf %135, %136 : vector<8x32xf32>
    %cst_69 = arith.constant dense<0.000000e+00> : vector<8x32xf32>
    %138 = tpu.matmul %137, %10, %cst_69 {dimension_numbers = #tpu.dot_dimension_numbers<[1], [0], [0], [1], [0, 0, 1, 1], [], []>} : vector<8x32xf32>, vector<32x32xf32>, vector<8x32xf32> -> vector<8x32xf32>
    %139 = vector.broadcast %11 : vector<1x32xf32> to vector<8x32xf32>
    %140 = arith.addf %138, %139 : vector<8x32xf32>
    %cst_70 = arith.constant 0.000000e+00 : f32
    %141 = vector.broadcast %cst_70 : f32 to vector<8x32xf32>
    %142 = arith.maximumf %140, %141 : vector<8x32xf32>
    %cst_71 = arith.constant dense<0.000000e+00> : vector<8x16xf32>
    %143 = tpu.matmul %142, %12, %cst_71 {dimension_numbers = #tpu.dot_dimension_numbers<[1], [0], [0], [1], [0, 0, 1, 1], [], []>} : vector<8x32xf32>, vector<32x16xf32>, vector<8x16xf32> -> vector<8x16xf32>
    %144 = vector.broadcast %13 : vector<1x16xf32> to vector<8x16xf32>
    %145 = arith.addf %143, %144 : vector<8x16xf32>
    %cst_72 = arith.constant dense<0.000000e+00> : vector<8x16xf32>
    %146 = tpu.matmul %132, %14, %cst_72 {dimension_numbers = #tpu.dot_dimension_numbers<[1], [0], [0], [1], [0, 0, 1, 1], [], []>} : vector<8x32xf32>, vector<32x16xf32>, vector<8x16xf32> -> vector<8x16xf32>
    %147 = vector.broadcast %15 : vector<1x16xf32> to vector<8x16xf32>
    %148 = arith.addf %146, %147 : vector<8x16xf32>
    %cst_73 = arith.constant 2.000000e+01 : f32
    %149 = vector.broadcast %cst_73 : f32 to vector<8x16xf32>
    %150 = arith.cmpf ogt, %148, %149 : vector<8x16xf32>
    %cst_74 = arith.constant 2.000000e+01 : f32
    %151 = vector.broadcast %cst_74 : f32 to vector<8x16xf32>
    %152 = arith.minimumf %148, %151 : vector<8x16xf32>
    %153 = math.exp %152 : vector<8x16xf32>
    %154 = math.log1p %153 : vector<8x16xf32>
    %155 = arith.select %150, %148, %154 : vector<8x16xi1>, vector<8x16xf32>
    %cst_75 = arith.constant 0.00999999977 : f32
    %156 = vector.broadcast %cst_75 : f32 to vector<8x16xf32>
    %157 = arith.addf %155, %156 : vector<8x16xf32>
    %158 = arith.index_cast %c2_i32 : i32 to index
    %c0_76 = arith.constant 0 : index
    %c0_77 = arith.constant 0 : index
    %159 = vector.load %arg2[%158, %c0_76, %c0_77] : memref<10x8x1xf32, #tpu.memory_space<vmem>>, vector<1x8x1xf32>
    %160 = vector.shape_cast %159 : vector<1x8x1xf32> to vector<8x1xf32>
    %161 = arith.mulf %160, %2 : vector<8x1xf32>
    %162 = vector.broadcast %1 : vector<8x1xf32> to vector<8x16xf32>
    %163 = arith.mulf %145, %162 : vector<8x16xf32>
    %164 = arith.addf %112, %163 : vector<8x16xf32>
    %165 = vector.broadcast %161 : vector<8x1xf32> to vector<8x16xf32>
    %166 = arith.mulf %157, %165 : vector<8x16xf32>
    %167 = arith.addf %164, %166 : vector<8x16xf32>
    %c1_i32_78 = arith.constant 1 : i32
    %168 = arith.addi %c2_i32, %c1_i32_78 : i32
    %169 = arith.index_cast %168 : i32 to index
    %c0_79 = arith.constant 0 : index
    %c0_80 = arith.constant 0 : index
    %170 = vector.load %arg13[%169, %c0_79, %c0_80] : memref<11x8x16xf32, #tpu.memory_space<vmem>>, vector<1x8x16xf32>
    %171 = vector.shape_cast %170 : vector<1x8x16xf32> to vector<8x16xf32>
    %172 = vector.shape_cast %167 : vector<8x16xf32> to vector<1x8x16xf32>
    tpu.vector_store %arg13[%169, %c0_79, %c0_80], %172 {strides = array<i32>} : memref<11x8x16xf32, #tpu.memory_space<vmem>>, vector<1x8x16xf32>,
    %173 = arith.index_cast %c2_i32 : i32 to index
    %c0_81 = arith.constant 0 : index
    %c0_82 = arith.constant 0 : index
    %174 = vector.load %arg14[%173, %c0_81, %c0_82] : memref<10x8x16xf32, #tpu.memory_space<vmem>>, vector<1x8x16xf32>
    %175 = vector.shape_cast %174 : vector<1x8x16xf32> to vector<8x16xf32>
    %176 = vector.shape_cast %145 : vector<8x16xf32> to vector<1x8x16xf32>
    tpu.vector_store %arg14[%173, %c0_81, %c0_82], %176 {strides = array<i32>} : memref<10x8x16xf32, #tpu.memory_space<vmem>>, vector<1x8x16xf32>,
    %177 = arith.index_cast %c2_i32 : i32 to index
    %c0_83 = arith.constant 0 : index
    %c0_84 = arith.constant 0 : index
    %178 = vector.load %arg15[%177, %c0_83, %c0_84] : memref<10x8x16xf32, #tpu.memory_space<vmem>>, vector<1x8x16xf32>
    %179 = vector.shape_cast %178 : vector<1x8x16xf32> to vector<8x16xf32>
    %180 = vector.shape_cast %157 : vector<8x16xf32> to vector<1x8x16xf32>
    tpu.vector_store %arg15[%177, %c0_83, %c0_84], %180 {strides = array<i32>} : memref<10x8x16xf32, #tpu.memory_space<vmem>>, vector<1x8x16xf32>,
    %c3_i32 = arith.constant 3 : i32
    %cst_85 = arith.constant dense<0.000000e+00> : vector<8x64xf32>
    %181 = tpu.matmul %167, %6, %cst_85 {dimension_numbers = #tpu.dot_dimension_numbers<[1], [0], [0], [1], [0, 0, 1, 1], [], []>} : vector<8x16xf32>, vector<16x64xf32>, vector<8x64xf32> -> vector<8x64xf32>
    %182 = vector.broadcast %7 : vector<1x64xf32> to vector<8x64xf32>
    %183 = arith.addf %181, %182 : vector<8x64xf32>
    %cst_86 = arith.constant 0.000000e+00 : f32
    %184 = vector.broadcast %cst_86 : f32 to vector<8x64xf32>
    %185 = arith.maximumf %183, %184 : vector<8x64xf32>
    %186 = vector.extract_strided_slice %185 {offsets = [0, 0], sizes = [8, 32], strides = [1, 1]} : vector<8x64xf32> to vector<8x32xf32>
    %187 = vector.extract_strided_slice %185 {offsets = [0, 32], sizes = [8, 32], strides = [1, 1]} : vector<8x64xf32> to vector<8x32xf32>
    %cst_87 = arith.constant dense<0.000000e+00> : vector<8x32xf32>
    %188 = tpu.matmul %186, %8, %cst_87 {dimension_numbers = #tpu.dot_dimension_numbers<[1], [0], [0], [1], [0, 0, 1, 1], [], []>} : vector<8x32xf32>, vector<32x32xf32>, vector<8x32xf32> -> vector<8x32xf32>
    %189 = vector.broadcast %9 : vector<1x32xf32> to vector<8x32xf32>
    %190 = arith.addf %188, %189 : vector<8x32xf32>
    %cst_88 = arith.constant 0.000000e+00 : f32
    %191 = vector.broadcast %cst_88 : f32 to vector<8x32xf32>
    %192 = arith.maximumf %190, %191 : vector<8x32xf32>
    %cst_89 = arith.constant dense<0.000000e+00> : vector<8x32xf32>
    %193 = tpu.matmul %192, %10, %cst_89 {dimension_numbers = #tpu.dot_dimension_numbers<[1], [0], [0], [1], [0, 0, 1, 1], [], []>} : vector<8x32xf32>, vector<32x32xf32>, vector<8x32xf32> -> vector<8x32xf32>
    %194 = vector.broadcast %11 : vector<1x32xf32> to vector<8x32xf32>
    %195 = arith.addf %193, %194 : vector<8x32xf32>
    %cst_90 = arith.constant 0.000000e+00 : f32
    %196 = vector.broadcast %cst_90 : f32 to vector<8x32xf32>
    %197 = arith.maximumf %195, %196 : vector<8x32xf32>
    %cst_91 = arith.constant dense<0.000000e+00> : vector<8x16xf32>
    %198 = tpu.matmul %197, %12, %cst_91 {dimension_numbers = #tpu.dot_dimension_numbers<[1], [0], [0], [1], [0, 0, 1, 1], [], []>} : vector<8x32xf32>, vector<32x16xf32>, vector<8x16xf32> -> vector<8x16xf32>
    %199 = vector.broadcast %13 : vector<1x16xf32> to vector<8x16xf32>
    %200 = arith.addf %198, %199 : vector<8x16xf32>
    %cst_92 = arith.constant dense<0.000000e+00> : vector<8x16xf32>
    %201 = tpu.matmul %187, %14, %cst_92 {dimension_numbers = #tpu.dot_dimension_numbers<[1], [0], [0], [1], [0, 0, 1, 1], [], []>} : vector<8x32xf32>, vector<32x16xf32>, vector<8x16xf32> -> vector<8x16xf32>
    %202 = vector.broadcast %15 : vector<1x16xf32> to vector<8x16xf32>
    %203 = arith.addf %201, %202 : vector<8x16xf32>
    %cst_93 = arith.constant 2.000000e+01 : f32
    %204 = vector.broadcast %cst_93 : f32 to vector<8x16xf32>
    %205 = arith.cmpf ogt, %203, %204 : vector<8x16xf32>
    %cst_94 = arith.constant 2.000000e+01 : f32
    %206 = vector.broadcast %cst_94 : f32 to vector<8x16xf32>
    %207 = arith.minimumf %203, %206 : vector<8x16xf32>
    %208 = math.exp %207 : vector<8x16xf32>
    %209 = math.log1p %208 : vector<8x16xf32>
    %210 = arith.select %205, %203, %209 : vector<8x16xi1>, vector<8x16xf32>
    %cst_95 = arith.constant 0.00999999977 : f32
    %211 = vector.broadcast %cst_95 : f32 to vector<8x16xf32>
    %212 = arith.addf %210, %211 : vector<8x16xf32>
    %213 = arith.index_cast %c3_i32 : i32 to index
    %c0_96 = arith.constant 0 : index
    %c0_97 = arith.constant 0 : index
    %214 = vector.load %arg2[%213, %c0_96, %c0_97] : memref<10x8x1xf32, #tpu.memory_space<vmem>>, vector<1x8x1xf32>
    %215 = vector.shape_cast %214 : vector<1x8x1xf32> to vector<8x1xf32>
    %216 = arith.mulf %215, %2 : vector<8x1xf32>
    %217 = vector.broadcast %1 : vector<8x1xf32> to vector<8x16xf32>
    %218 = arith.mulf %200, %217 : vector<8x16xf32>
    %219 = arith.addf %167, %218 : vector<8x16xf32>
    %220 = vector.broadcast %216 : vector<8x1xf32> to vector<8x16xf32>
    %221 = arith.mulf %212, %220 : vector<8x16xf32>
    %222 = arith.addf %219, %221 : vector<8x16xf32>
    %c1_i32_98 = arith.constant 1 : i32
    %223 = arith.addi %c3_i32, %c1_i32_98 : i32
    %224 = arith.index_cast %223 : i32 to index
    %c0_99 = arith.constant 0 : index
    %c0_100 = arith.constant 0 : index
    %225 = vector.load %arg13[%224, %c0_99, %c0_100] : memref<11x8x16xf32, #tpu.memory_space<vmem>>, vector<1x8x16xf32>
    %226 = vector.shape_cast %225 : vector<1x8x16xf32> to vector<8x16xf32>
    %227 = vector.shape_cast %222 : vector<8x16xf32> to vector<1x8x16xf32>
    tpu.vector_store %arg13[%224, %c0_99, %c0_100], %227 {strides = array<i32>} : memref<11x8x16xf32, #tpu.memory_space<vmem>>, vector<1x8x16xf32>,
    %228 = arith.index_cast %c3_i32 : i32 to index
    %c0_101 = arith.constant 0 : index
    %c0_102 = arith.constant 0 : index
    %229 = vector.load %arg14[%228, %c0_101, %c0_102] : memref<10x8x16xf32, #tpu.memory_space<vmem>>, vector<1x8x16xf32>
    %230 = vector.shape_cast %229 : vector<1x8x16xf32> to vector<8x16xf32>
    %231 = vector.shape_cast %200 : vector<8x16xf32> to vector<1x8x16xf32>
    tpu.vector_store %arg14[%228, %c0_101, %c0_102], %231 {strides = array<i32>} : memref<10x8x16xf32, #tpu.memory_space<vmem>>, vector<1x8x16xf32>,
    %232 = arith.index_cast %c3_i32 : i32 to index
    %c0_103 = arith.constant 0 : index
    %c0_104 = arith.constant 0 : index
    %233 = vector.load %arg15[%232, %c0_103, %c0_104] : memref<10x8x16xf32, #tpu.memory_space<vmem>>, vector<1x8x16xf32>
    %234 = vector.shape_cast %233 : vector<1x8x16xf32> to vector<8x16xf32>
    %235 = vector.shape_cast %212 : vector<8x16xf32> to vector<1x8x16xf32>
    tpu.vector_store %arg15[%232, %c0_103, %c0_104], %235 {strides = array<i32>} : memref<10x8x16xf32, #tpu.memory_space<vmem>>, vector<1x8x16xf32>,
    %c4_i32 = arith.constant 4 : i32
    %cst_105 = arith.constant dense<0.000000e+00> : vector<8x64xf32>
    %236 = tpu.matmul %222, %6, %cst_105 {dimension_numbers = #tpu.dot_dimension_numbers<[1], [0], [0], [1], [0, 0, 1, 1], [], []>} : vector<8x16xf32>, vector<16x64xf32>, vector<8x64xf32> -> vector<8x64xf32>
    %237 = vector.broadcast %7 : vector<1x64xf32> to vector<8x64xf32>
    %238 = arith.addf %236, %237 : vector<8x64xf32>
    %cst_106 = arith.constant 0.000000e+00 : f32
    %239 = vector.broadcast %cst_106 : f32 to vector<8x64xf32>
    %240 = arith.maximumf %238, %239 : vector<8x64xf32>
    %241 = vector.extract_strided_slice %240 {offsets = [0, 0], sizes = [8, 32], strides = [1, 1]} : vector<8x64xf32> to vector<8x32xf32>
    %242 = vector.extract_strided_slice %240 {offsets = [0, 32], sizes = [8, 32], strides = [1, 1]} : vector<8x64xf32> to vector<8x32xf32>
    %cst_107 = arith.constant dense<0.000000e+00> : vector<8x32xf32>
    %243 = tpu.matmul %241, %8, %cst_107 {dimension_numbers = #tpu.dot_dimension_numbers<[1], [0], [0], [1], [0, 0, 1, 1], [], []>} : vector<8x32xf32>, vector<32x32xf32>, vector<8x32xf32> -> vector<8x32xf32>
    %244 = vector.broadcast %9 : vector<1x32xf32> to vector<8x32xf32>
    %245 = arith.addf %243, %244 : vector<8x32xf32>
    %cst_108 = arith.constant 0.000000e+00 : f32
    %246 = vector.broadcast %cst_108 : f32 to vector<8x32xf32>
    %247 = arith.maximumf %245, %246 : vector<8x32xf32>
    %cst_109 = arith.constant dense<0.000000e+00> : vector<8x32xf32>
    %248 = tpu.matmul %247, %10, %cst_109 {dimension_numbers = #tpu.dot_dimension_numbers<[1], [0], [0], [1], [0, 0, 1, 1], [], []>} : vector<8x32xf32>, vector<32x32xf32>, vector<8x32xf32> -> vector<8x32xf32>
    %249 = vector.broadcast %11 : vector<1x32xf32> to vector<8x32xf32>
    %250 = arith.addf %248, %249 : vector<8x32xf32>
    %cst_110 = arith.constant 0.000000e+00 : f32
    %251 = vector.broadcast %cst_110 : f32 to vector<8x32xf32>
    %252 = arith.maximumf %250, %251 : vector<8x32xf32>
    %cst_111 = arith.constant dense<0.000000e+00> : vector<8x16xf32>
    %253 = tpu.matmul %252, %12, %cst_111 {dimension_numbers = #tpu.dot_dimension_numbers<[1], [0], [0], [1], [0, 0, 1, 1], [], []>} : vector<8x32xf32>, vector<32x16xf32>, vector<8x16xf32> -> vector<8x16xf32>
    %254 = vector.broadcast %13 : vector<1x16xf32> to vector<8x16xf32>
    %255 = arith.addf %253, %254 : vector<8x16xf32>
    %cst_112 = arith.constant dense<0.000000e+00> : vector<8x16xf32>
    %256 = tpu.matmul %242, %14, %cst_112 {dimension_numbers = #tpu.dot_dimension_numbers<[1], [0], [0], [1], [0, 0, 1, 1], [], []>} : vector<8x32xf32>, vector<32x16xf32>, vector<8x16xf32> -> vector<8x16xf32>
    %257 = vector.broadcast %15 : vector<1x16xf32> to vector<8x16xf32>
    %258 = arith.addf %256, %257 : vector<8x16xf32>
    %cst_113 = arith.constant 2.000000e+01 : f32
    %259 = vector.broadcast %cst_113 : f32 to vector<8x16xf32>
    %260 = arith.cmpf ogt, %258, %259 : vector<8x16xf32>
    %cst_114 = arith.constant 2.000000e+01 : f32
    %261 = vector.broadcast %cst_114 : f32 to vector<8x16xf32>
    %262 = arith.minimumf %258, %261 : vector<8x16xf32>
    %263 = math.exp %262 : vector<8x16xf32>
    %264 = math.log1p %263 : vector<8x16xf32>
    %265 = arith.select %260, %258, %264 : vector<8x16xi1>, vector<8x16xf32>
    %cst_115 = arith.constant 0.00999999977 : f32
    %266 = vector.broadcast %cst_115 : f32 to vector<8x16xf32>
    %267 = arith.addf %265, %266 : vector<8x16xf32>
    %268 = arith.index_cast %c4_i32 : i32 to index
    %c0_116 = arith.constant 0 : index
    %c0_117 = arith.constant 0 : index
    %269 = vector.load %arg2[%268, %c0_116, %c0_117] : memref<10x8x1xf32, #tpu.memory_space<vmem>>, vector<1x8x1xf32>
    %270 = vector.shape_cast %269 : vector<1x8x1xf32> to vector<8x1xf32>
    %271 = arith.mulf %270, %2 : vector<8x1xf32>
    %272 = vector.broadcast %1 : vector<8x1xf32> to vector<8x16xf32>
    %273 = arith.mulf %255, %272 : vector<8x16xf32>
    %274 = arith.addf %222, %273 : vector<8x16xf32>
    %275 = vector.broadcast %271 : vector<8x1xf32> to vector<8x16xf32>
    %276 = arith.mulf %267, %275 : vector<8x16xf32>
    %277 = arith.addf %274, %276 : vector<8x16xf32>
    %c1_i32_118 = arith.constant 1 : i32
    %278 = arith.addi %c4_i32, %c1_i32_118 : i32
    %279 = arith.index_cast %278 : i32 to index
    %c0_119 = arith.constant 0 : index
    %c0_120 = arith.constant 0 : index
    %280 = vector.load %arg13[%279, %c0_119, %c0_120] : memref<11x8x16xf32, #tpu.memory_space<vmem>>, vector<1x8x16xf32>
    %281 = vector.shape_cast %280 : vector<1x8x16xf32> to vector<8x16xf32>
    %282 = vector.shape_cast %277 : vector<8x16xf32> to vector<1x8x16xf32>
    tpu.vector_store %arg13[%279, %c0_119, %c0_120], %282 {strides = array<i32>} : memref<11x8x16xf32, #tpu.memory_space<vmem>>, vector<1x8x16xf32>,
    %283 = arith.index_cast %c4_i32 : i32 to index
    %c0_121 = arith.constant 0 : index
    %c0_122 = arith.constant 0 : index
    %284 = vector.load %arg14[%283, %c0_121, %c0_122] : memref<10x8x16xf32, #tpu.memory_space<vmem>>, vector<1x8x16xf32>
    %285 = vector.shape_cast %284 : vector<1x8x16xf32> to vector<8x16xf32>
    %286 = vector.shape_cast %255 : vector<8x16xf32> to vector<1x8x16xf32>
    tpu.vector_store %arg14[%283, %c0_121, %c0_122], %286 {strides = array<i32>} : memref<10x8x16xf32, #tpu.memory_space<vmem>>, vector<1x8x16xf32>,
    %287 = arith.index_cast %c4_i32 : i32 to index
    %c0_123 = arith.constant 0 : index
    %c0_124 = arith.constant 0 : index
    %288 = vector.load %arg15[%287, %c0_123, %c0_124] : memref<10x8x16xf32, #tpu.memory_space<vmem>>, vector<1x8x16xf32>
    %289 = vector.shape_cast %288 : vector<1x8x16xf32> to vector<8x16xf32>
    %290 = vector.shape_cast %267 : vector<8x16xf32> to vector<1x8x16xf32>
    tpu.vector_store %arg15[%287, %c0_123, %c0_124], %290 {strides = array<i32>} : memref<10x8x16xf32, #tpu.memory_space<vmem>>, vector<1x8x16xf32>,
    %c5_i32 = arith.constant 5 : i32
    %cst_125 = arith.constant dense<0.000000e+00> : vector<8x64xf32>
    %291 = tpu.matmul %277, %6, %cst_125 {dimension_numbers = #tpu.dot_dimension_numbers<[1], [0], [0], [1], [0, 0, 1, 1], [], []>} : vector<8x16xf32>, vector<16x64xf32>, vector<8x64xf32> -> vector<8x64xf32>
    %292 = vector.broadcast %7 : vector<1x64xf32> to vector<8x64xf32>
    %293 = arith.addf %291, %292 : vector<8x64xf32>
    %cst_126 = arith.constant 0.000000e+00 : f32
    %294 = vector.broadcast %cst_126 : f32 to vector<8x64xf32>
    %295 = arith.maximumf %293, %294 : vector<8x64xf32>
    %296 = vector.extract_strided_slice %295 {offsets = [0, 0], sizes = [8, 32], strides = [1, 1]} : vector<8x64xf32> to vector<8x32xf32>
    %297 = vector.extract_strided_slice %295 {offsets = [0, 32], sizes = [8, 32], strides = [1, 1]} : vector<8x64xf32> to vector<8x32xf32>
    %cst_127 = arith.constant dense<0.000000e+00> : vector<8x32xf32>
    %298 = tpu.matmul %296, %8, %cst_127 {dimension_numbers = #tpu.dot_dimension_numbers<[1], [0], [0], [1], [0, 0, 1, 1], [], []>} : vector<8x32xf32>, vector<32x32xf32>, vector<8x32xf32> -> vector<8x32xf32>
    %299 = vector.broadcast %9 : vector<1x32xf32> to vector<8x32xf32>
    %300 = arith.addf %298, %299 : vector<8x32xf32>
    %cst_128 = arith.constant 0.000000e+00 : f32
    %301 = vector.broadcast %cst_128 : f32 to vector<8x32xf32>
    %302 = arith.maximumf %300, %301 : vector<8x32xf32>
    %cst_129 = arith.constant dense<0.000000e+00> : vector<8x32xf32>
    %303 = tpu.matmul %302, %10, %cst_129 {dimension_numbers = #tpu.dot_dimension_numbers<[1], [0], [0], [1], [0, 0, 1, 1], [], []>} : vector<8x32xf32>, vector<32x32xf32>, vector<8x32xf32> -> vector<8x32xf32>
    %304 = vector.broadcast %11 : vector<1x32xf32> to vector<8x32xf32>
    %305 = arith.addf %303, %304 : vector<8x32xf32>
    %cst_130 = arith.constant 0.000000e+00 : f32
    %306 = vector.broadcast %cst_130 : f32 to vector<8x32xf32>
    %307 = arith.maximumf %305, %306 : vector<8x32xf32>
    %cst_131 = arith.constant dense<0.000000e+00> : vector<8x16xf32>
    %308 = tpu.matmul %307, %12, %cst_131 {dimension_numbers = #tpu.dot_dimension_numbers<[1], [0], [0], [1], [0, 0, 1, 1], [], []>} : vector<8x32xf32>, vector<32x16xf32>, vector<8x16xf32> -> vector<8x16xf32>
    %309 = vector.broadcast %13 : vector<1x16xf32> to vector<8x16xf32>
    %310 = arith.addf %308, %309 : vector<8x16xf32>
    %cst_132 = arith.constant dense<0.000000e+00> : vector<8x16xf32>
    %311 = tpu.matmul %297, %14, %cst_132 {dimension_numbers = #tpu.dot_dimension_numbers<[1], [0], [0], [1], [0, 0, 1, 1], [], []>} : vector<8x32xf32>, vector<32x16xf32>, vector<8x16xf32> -> vector<8x16xf32>
    %312 = vector.broadcast %15 : vector<1x16xf32> to vector<8x16xf32>
    %313 = arith.addf %311, %312 : vector<8x16xf32>
    %cst_133 = arith.constant 2.000000e+01 : f32
    %314 = vector.broadcast %cst_133 : f32 to vector<8x16xf32>
    %315 = arith.cmpf ogt, %313, %314 : vector<8x16xf32>
    %cst_134 = arith.constant 2.000000e+01 : f32
    %316 = vector.broadcast %cst_134 : f32 to vector<8x16xf32>
    %317 = arith.minimumf %313, %316 : vector<8x16xf32>
    %318 = math.exp %317 : vector<8x16xf32>
    %319 = math.log1p %318 : vector<8x16xf32>
    %320 = arith.select %315, %313, %319 : vector<8x16xi1>, vector<8x16xf32>
    %cst_135 = arith.constant 0.00999999977 : f32
    %321 = vector.broadcast %cst_135 : f32 to vector<8x16xf32>
    %322 = arith.addf %320, %321 : vector<8x16xf32>
    %323 = arith.index_cast %c5_i32 : i32 to index
    %c0_136 = arith.constant 0 : index
    %c0_137 = arith.constant 0 : index
    %324 = vector.load %arg2[%323, %c0_136, %c0_137] : memref<10x8x1xf32, #tpu.memory_space<vmem>>, vector<1x8x1xf32>
    %325 = vector.shape_cast %324 : vector<1x8x1xf32> to vector<8x1xf32>
    %326 = arith.mulf %325, %2 : vector<8x1xf32>
    %327 = vector.broadcast %1 : vector<8x1xf32> to vector<8x16xf32>
    %328 = arith.mulf %310, %327 : vector<8x16xf32>
    %329 = arith.addf %277, %328 : vector<8x16xf32>
    %330 = vector.broadcast %326 : vector<8x1xf32> to vector<8x16xf32>
    %331 = arith.mulf %322, %330 : vector<8x16xf32>
    %332 = arith.addf %329, %331 : vector<8x16xf32>
    %c1_i32_138 = arith.constant 1 : i32
    %333 = arith.addi %c5_i32, %c1_i32_138 : i32
    %334 = arith.index_cast %333 : i32 to index
    %c0_139 = arith.constant 0 : index
    %c0_140 = arith.constant 0 : index
    %335 = vector.load %arg13[%334, %c0_139, %c0_140] : memref<11x8x16xf32, #tpu.memory_space<vmem>>, vector<1x8x16xf32>
    %336 = vector.shape_cast %335 : vector<1x8x16xf32> to vector<8x16xf32>
    %337 = vector.shape_cast %332 : vector<8x16xf32> to vector<1x8x16xf32>
    tpu.vector_store %arg13[%334, %c0_139, %c0_140], %337 {strides = array<i32>} : memref<11x8x16xf32, #tpu.memory_space<vmem>>, vector<1x8x16xf32>,
    %338 = arith.index_cast %c5_i32 : i32 to index
    %c0_141 = arith.constant 0 : index
    %c0_142 = arith.constant 0 : index
    %339 = vector.load %arg14[%338, %c0_141, %c0_142] : memref<10x8x16xf32, #tpu.memory_space<vmem>>, vector<1x8x16xf32>
    %340 = vector.shape_cast %339 : vector<1x8x16xf32> to vector<8x16xf32>
    %341 = vector.shape_cast %310 : vector<8x16xf32> to vector<1x8x16xf32>
    tpu.vector_store %arg14[%338, %c0_141, %c0_142], %341 {strides = array<i32>} : memref<10x8x16xf32, #tpu.memory_space<vmem>>, vector<1x8x16xf32>,
    %342 = arith.index_cast %c5_i32 : i32 to index
    %c0_143 = arith.constant 0 : index
    %c0_144 = arith.constant 0 : index
    %343 = vector.load %arg15[%342, %c0_143, %c0_144] : memref<10x8x16xf32, #tpu.memory_space<vmem>>, vector<1x8x16xf32>
    %344 = vector.shape_cast %343 : vector<1x8x16xf32> to vector<8x16xf32>
    %345 = vector.shape_cast %322 : vector<8x16xf32> to vector<1x8x16xf32>
    tpu.vector_store %arg15[%342, %c0_143, %c0_144], %345 {strides = array<i32>} : memref<10x8x16xf32, #tpu.memory_space<vmem>>, vector<1x8x16xf32>,
    %c6_i32 = arith.constant 6 : i32
    %cst_145 = arith.constant dense<0.000000e+00> : vector<8x64xf32>
    %346 = tpu.matmul %332, %6, %cst_145 {dimension_numbers = #tpu.dot_dimension_numbers<[1], [0], [0], [1], [0, 0, 1, 1], [], []>} : vector<8x16xf32>, vector<16x64xf32>, vector<8x64xf32> -> vector<8x64xf32>
    %347 = vector.broadcast %7 : vector<1x64xf32> to vector<8x64xf32>
    %348 = arith.addf %346, %347 : vector<8x64xf32>
    %cst_146 = arith.constant 0.000000e+00 : f32
    %349 = vector.broadcast %cst_146 : f32 to vector<8x64xf32>
    %350 = arith.maximumf %348, %349 : vector<8x64xf32>
    %351 = vector.extract_strided_slice %350 {offsets = [0, 0], sizes = [8, 32], strides = [1, 1]} : vector<8x64xf32> to vector<8x32xf32>
    %352 = vector.extract_strided_slice %350 {offsets = [0, 32], sizes = [8, 32], strides = [1, 1]} : vector<8x64xf32> to vector<8x32xf32>
    %cst_147 = arith.constant dense<0.000000e+00> : vector<8x32xf32>
    %353 = tpu.matmul %351, %8, %cst_147 {dimension_numbers = #tpu.dot_dimension_numbers<[1], [0], [0], [1], [0, 0, 1, 1], [], []>} : vector<8x32xf32>, vector<32x32xf32>, vector<8x32xf32> -> vector<8x32xf32>
    %354 = vector.broadcast %9 : vector<1x32xf32> to vector<8x32xf32>
    %355 = arith.addf %353, %354 : vector<8x32xf32>
    %cst_148 = arith.constant 0.000000e+00 : f32
    %356 = vector.broadcast %cst_148 : f32 to vector<8x32xf32>
    %357 = arith.maximumf %355, %356 : vector<8x32xf32>
    %cst_149 = arith.constant dense<0.000000e+00> : vector<8x32xf32>
    %358 = tpu.matmul %357, %10, %cst_149 {dimension_numbers = #tpu.dot_dimension_numbers<[1], [0], [0], [1], [0, 0, 1, 1], [], []>} : vector<8x32xf32>, vector<32x32xf32>, vector<8x32xf32> -> vector<8x32xf32>
    %359 = vector.broadcast %11 : vector<1x32xf32> to vector<8x32xf32>
    %360 = arith.addf %358, %359 : vector<8x32xf32>
    %cst_150 = arith.constant 0.000000e+00 : f32
    %361 = vector.broadcast %cst_150 : f32 to vector<8x32xf32>
    %362 = arith.maximumf %360, %361 : vector<8x32xf32>
    %cst_151 = arith.constant dense<0.000000e+00> : vector<8x16xf32>
    %363 = tpu.matmul %362, %12, %cst_151 {dimension_numbers = #tpu.dot_dimension_numbers<[1], [0], [0], [1], [0, 0, 1, 1], [], []>} : vector<8x32xf32>, vector<32x16xf32>, vector<8x16xf32> -> vector<8x16xf32>
    %364 = vector.broadcast %13 : vector<1x16xf32> to vector<8x16xf32>
    %365 = arith.addf %363, %364 : vector<8x16xf32>
    %cst_152 = arith.constant dense<0.000000e+00> : vector<8x16xf32>
    %366 = tpu.matmul %352, %14, %cst_152 {dimension_numbers = #tpu.dot_dimension_numbers<[1], [0], [0], [1], [0, 0, 1, 1], [], []>} : vector<8x32xf32>, vector<32x16xf32>, vector<8x16xf32> -> vector<8x16xf32>
    %367 = vector.broadcast %15 : vector<1x16xf32> to vector<8x16xf32>
    %368 = arith.addf %366, %367 : vector<8x16xf32>
    %cst_153 = arith.constant 2.000000e+01 : f32
    %369 = vector.broadcast %cst_153 : f32 to vector<8x16xf32>
    %370 = arith.cmpf ogt, %368, %369 : vector<8x16xf32>
    %cst_154 = arith.constant 2.000000e+01 : f32
    %371 = vector.broadcast %cst_154 : f32 to vector<8x16xf32>
    %372 = arith.minimumf %368, %371 : vector<8x16xf32>
    %373 = math.exp %372 : vector<8x16xf32>
    %374 = math.log1p %373 : vector<8x16xf32>
    %375 = arith.select %370, %368, %374 : vector<8x16xi1>, vector<8x16xf32>
    %cst_155 = arith.constant 0.00999999977 : f32
    %376 = vector.broadcast %cst_155 : f32 to vector<8x16xf32>
    %377 = arith.addf %375, %376 : vector<8x16xf32>
    %378 = arith.index_cast %c6_i32 : i32 to index
    %c0_156 = arith.constant 0 : index
    %c0_157 = arith.constant 0 : index
    %379 = vector.load %arg2[%378, %c0_156, %c0_157] : memref<10x8x1xf32, #tpu.memory_space<vmem>>, vector<1x8x1xf32>
    %380 = vector.shape_cast %379 : vector<1x8x1xf32> to vector<8x1xf32>
    %381 = arith.mulf %380, %2 : vector<8x1xf32>
    %382 = vector.broadcast %1 : vector<8x1xf32> to vector<8x16xf32>
    %383 = arith.mulf %365, %382 : vector<8x16xf32>
    %384 = arith.addf %332, %383 : vector<8x16xf32>
    %385 = vector.broadcast %381 : vector<8x1xf32> to vector<8x16xf32>
    %386 = arith.mulf %377, %385 : vector<8x16xf32>
    %387 = arith.addf %384, %386 : vector<8x16xf32>
    %c1_i32_158 = arith.constant 1 : i32
    %388 = arith.addi %c6_i32, %c1_i32_158 : i32
    %389 = arith.index_cast %388 : i32 to index
    %c0_159 = arith.constant 0 : index
    %c0_160 = arith.constant 0 : index
    %390 = vector.load %arg13[%389, %c0_159, %c0_160] : memref<11x8x16xf32, #tpu.memory_space<vmem>>, vector<1x8x16xf32>
    %391 = vector.shape_cast %390 : vector<1x8x16xf32> to vector<8x16xf32>
    %392 = vector.shape_cast %387 : vector<8x16xf32> to vector<1x8x16xf32>
    tpu.vector_store %arg13[%389, %c0_159, %c0_160], %392 {strides = array<i32>} : memref<11x8x16xf32, #tpu.memory_space<vmem>>, vector<1x8x16xf32>,
    %393 = arith.index_cast %c6_i32 : i32 to index
    %c0_161 = arith.constant 0 : index
    %c0_162 = arith.constant 0 : index
    %394 = vector.load %arg14[%393, %c0_161, %c0_162] : memref<10x8x16xf32, #tpu.memory_space<vmem>>, vector<1x8x16xf32>
    %395 = vector.shape_cast %394 : vector<1x8x16xf32> to vector<8x16xf32>
    %396 = vector.shape_cast %365 : vector<8x16xf32> to vector<1x8x16xf32>
    tpu.vector_store %arg14[%393, %c0_161, %c0_162], %396 {strides = array<i32>} : memref<10x8x16xf32, #tpu.memory_space<vmem>>, vector<1x8x16xf32>,
    %397 = arith.index_cast %c6_i32 : i32 to index
    %c0_163 = arith.constant 0 : index
    %c0_164 = arith.constant 0 : index
    %398 = vector.load %arg15[%397, %c0_163, %c0_164] : memref<10x8x16xf32, #tpu.memory_space<vmem>>, vector<1x8x16xf32>
    %399 = vector.shape_cast %398 : vector<1x8x16xf32> to vector<8x16xf32>
    %400 = vector.shape_cast %377 : vector<8x16xf32> to vector<1x8x16xf32>
    tpu.vector_store %arg15[%397, %c0_163, %c0_164], %400 {strides = array<i32>} : memref<10x8x16xf32, #tpu.memory_space<vmem>>, vector<1x8x16xf32>,
    %c7_i32 = arith.constant 7 : i32
    %cst_165 = arith.constant dense<0.000000e+00> : vector<8x64xf32>
    %401 = tpu.matmul %387, %6, %cst_165 {dimension_numbers = #tpu.dot_dimension_numbers<[1], [0], [0], [1], [0, 0, 1, 1], [], []>} : vector<8x16xf32>, vector<16x64xf32>, vector<8x64xf32> -> vector<8x64xf32>
    %402 = vector.broadcast %7 : vector<1x64xf32> to vector<8x64xf32>
    %403 = arith.addf %401, %402 : vector<8x64xf32>
    %cst_166 = arith.constant 0.000000e+00 : f32
    %404 = vector.broadcast %cst_166 : f32 to vector<8x64xf32>
    %405 = arith.maximumf %403, %404 : vector<8x64xf32>
    %406 = vector.extract_strided_slice %405 {offsets = [0, 0], sizes = [8, 32], strides = [1, 1]} : vector<8x64xf32> to vector<8x32xf32>
    %407 = vector.extract_strided_slice %405 {offsets = [0, 32], sizes = [8, 32], strides = [1, 1]} : vector<8x64xf32> to vector<8x32xf32>
    %cst_167 = arith.constant dense<0.000000e+00> : vector<8x32xf32>
    %408 = tpu.matmul %406, %8, %cst_167 {dimension_numbers = #tpu.dot_dimension_numbers<[1], [0], [0], [1], [0, 0, 1, 1], [], []>} : vector<8x32xf32>, vector<32x32xf32>, vector<8x32xf32> -> vector<8x32xf32>
    %409 = vector.broadcast %9 : vector<1x32xf32> to vector<8x32xf32>
    %410 = arith.addf %408, %409 : vector<8x32xf32>
    %cst_168 = arith.constant 0.000000e+00 : f32
    %411 = vector.broadcast %cst_168 : f32 to vector<8x32xf32>
    %412 = arith.maximumf %410, %411 : vector<8x32xf32>
    %cst_169 = arith.constant dense<0.000000e+00> : vector<8x32xf32>
    %413 = tpu.matmul %412, %10, %cst_169 {dimension_numbers = #tpu.dot_dimension_numbers<[1], [0], [0], [1], [0, 0, 1, 1], [], []>} : vector<8x32xf32>, vector<32x32xf32>, vector<8x32xf32> -> vector<8x32xf32>
    %414 = vector.broadcast %11 : vector<1x32xf32> to vector<8x32xf32>
    %415 = arith.addf %413, %414 : vector<8x32xf32>
    %cst_170 = arith.constant 0.000000e+00 : f32
    %416 = vector.broadcast %cst_170 : f32 to vector<8x32xf32>
    %417 = arith.maximumf %415, %416 : vector<8x32xf32>
    %cst_171 = arith.constant dense<0.000000e+00> : vector<8x16xf32>
    %418 = tpu.matmul %417, %12, %cst_171 {dimension_numbers = #tpu.dot_dimension_numbers<[1], [0], [0], [1], [0, 0, 1, 1], [], []>} : vector<8x32xf32>, vector<32x16xf32>, vector<8x16xf32> -> vector<8x16xf32>
    %419 = vector.broadcast %13 : vector<1x16xf32> to vector<8x16xf32>
    %420 = arith.addf %418, %419 : vector<8x16xf32>
    %cst_172 = arith.constant dense<0.000000e+00> : vector<8x16xf32>
    %421 = tpu.matmul %407, %14, %cst_172 {dimension_numbers = #tpu.dot_dimension_numbers<[1], [0], [0], [1], [0, 0, 1, 1], [], []>} : vector<8x32xf32>, vector<32x16xf32>, vector<8x16xf32> -> vector<8x16xf32>
    %422 = vector.broadcast %15 : vector<1x16xf32> to vector<8x16xf32>
    %423 = arith.addf %421, %422 : vector<8x16xf32>
    %cst_173 = arith.constant 2.000000e+01 : f32
    %424 = vector.broadcast %cst_173 : f32 to vector<8x16xf32>
    %425 = arith.cmpf ogt, %423, %424 : vector<8x16xf32>
    %cst_174 = arith.constant 2.000000e+01 : f32
    %426 = vector.broadcast %cst_174 : f32 to vector<8x16xf32>
    %427 = arith.minimumf %423, %426 : vector<8x16xf32>
    %428 = math.exp %427 : vector<8x16xf32>
    %429 = math.log1p %428 : vector<8x16xf32>
    %430 = arith.select %425, %423, %429 : vector<8x16xi1>, vector<8x16xf32>
    %cst_175 = arith.constant 0.00999999977 : f32
    %431 = vector.broadcast %cst_175 : f32 to vector<8x16xf32>
    %432 = arith.addf %430, %431 : vector<8x16xf32>
    %433 = arith.index_cast %c7_i32 : i32 to index
    %c0_176 = arith.constant 0 : index
    %c0_177 = arith.constant 0 : index
    %434 = vector.load %arg2[%433, %c0_176, %c0_177] : memref<10x8x1xf32, #tpu.memory_space<vmem>>, vector<1x8x1xf32>
    %435 = vector.shape_cast %434 : vector<1x8x1xf32> to vector<8x1xf32>
    %436 = arith.mulf %435, %2 : vector<8x1xf32>
    %437 = vector.broadcast %1 : vector<8x1xf32> to vector<8x16xf32>
    %438 = arith.mulf %420, %437 : vector<8x16xf32>
    %439 = arith.addf %387, %438 : vector<8x16xf32>
    %440 = vector.broadcast %436 : vector<8x1xf32> to vector<8x16xf32>
    %441 = arith.mulf %432, %440 : vector<8x16xf32>
    %442 = arith.addf %439, %441 : vector<8x16xf32>
    %c1_i32_178 = arith.constant 1 : i32
    %443 = arith.addi %c7_i32, %c1_i32_178 : i32
    %444 = arith.index_cast %443 : i32 to index
    %c0_179 = arith.constant 0 : index
    %c0_180 = arith.constant 0 : index
    %445 = vector.load %arg13[%444, %c0_179, %c0_180] : memref<11x8x16xf32, #tpu.memory_space<vmem>>, vector<1x8x16xf32>
    %446 = vector.shape_cast %445 : vector<1x8x16xf32> to vector<8x16xf32>
    %447 = vector.shape_cast %442 : vector<8x16xf32> to vector<1x8x16xf32>
    tpu.vector_store %arg13[%444, %c0_179, %c0_180], %447 {strides = array<i32>} : memref<11x8x16xf32, #tpu.memory_space<vmem>>, vector<1x8x16xf32>,
    %448 = arith.index_cast %c7_i32 : i32 to index
    %c0_181 = arith.constant 0 : index
    %c0_182 = arith.constant 0 : index
    %449 = vector.load %arg14[%448, %c0_181, %c0_182] : memref<10x8x16xf32, #tpu.memory_space<vmem>>, vector<1x8x16xf32>
    %450 = vector.shape_cast %449 : vector<1x8x16xf32> to vector<8x16xf32>
    %451 = vector.shape_cast %420 : vector<8x16xf32> to vector<1x8x16xf32>
    tpu.vector_store %arg14[%448, %c0_181, %c0_182], %451 {strides = array<i32>} : memref<10x8x16xf32, #tpu.memory_space<vmem>>, vector<1x8x16xf32>,
    %452 = arith.index_cast %c7_i32 : i32 to index
    %c0_183 = arith.constant 0 : index
    %c0_184 = arith.constant 0 : index
    %453 = vector.load %arg15[%452, %c0_183, %c0_184] : memref<10x8x16xf32, #tpu.memory_space<vmem>>, vector<1x8x16xf32>
    %454 = vector.shape_cast %453 : vector<1x8x16xf32> to vector<8x16xf32>
    %455 = vector.shape_cast %432 : vector<8x16xf32> to vector<1x8x16xf32>
    tpu.vector_store %arg15[%452, %c0_183, %c0_184], %455 {strides = array<i32>} : memref<10x8x16xf32, #tpu.memory_space<vmem>>, vector<1x8x16xf32>,
    %c8_i32 = arith.constant 8 : i32
    %cst_185 = arith.constant dense<0.000000e+00> : vector<8x64xf32>
    %456 = tpu.matmul %442, %6, %cst_185 {dimension_numbers = #tpu.dot_dimension_numbers<[1], [0], [0], [1], [0, 0, 1, 1], [], []>} : vector<8x16xf32>, vector<16x64xf32>, vector<8x64xf32> -> vector<8x64xf32>
    %457 = vector.broadcast %7 : vector<1x64xf32> to vector<8x64xf32>
    %458 = arith.addf %456, %457 : vector<8x64xf32>
    %cst_186 = arith.constant 0.000000e+00 : f32
    %459 = vector.broadcast %cst_186 : f32 to vector<8x64xf32>
    %460 = arith.maximumf %458, %459 : vector<8x64xf32>
    %461 = vector.extract_strided_slice %460 {offsets = [0, 0], sizes = [8, 32], strides = [1, 1]} : vector<8x64xf32> to vector<8x32xf32>
    %462 = vector.extract_strided_slice %460 {offsets = [0, 32], sizes = [8, 32], strides = [1, 1]} : vector<8x64xf32> to vector<8x32xf32>
    %cst_187 = arith.constant dense<0.000000e+00> : vector<8x32xf32>
    %463 = tpu.matmul %461, %8, %cst_187 {dimension_numbers = #tpu.dot_dimension_numbers<[1], [0], [0], [1], [0, 0, 1, 1], [], []>} : vector<8x32xf32>, vector<32x32xf32>, vector<8x32xf32> -> vector<8x32xf32>
    %464 = vector.broadcast %9 : vector<1x32xf32> to vector<8x32xf32>
    %465 = arith.addf %463, %464 : vector<8x32xf32>
    %cst_188 = arith.constant 0.000000e+00 : f32
    %466 = vector.broadcast %cst_188 : f32 to vector<8x32xf32>
    %467 = arith.maximumf %465, %466 : vector<8x32xf32>
    %cst_189 = arith.constant dense<0.000000e+00> : vector<8x32xf32>
    %468 = tpu.matmul %467, %10, %cst_189 {dimension_numbers = #tpu.dot_dimension_numbers<[1], [0], [0], [1], [0, 0, 1, 1], [], []>} : vector<8x32xf32>, vector<32x32xf32>, vector<8x32xf32> -> vector<8x32xf32>
    %469 = vector.broadcast %11 : vector<1x32xf32> to vector<8x32xf32>
    %470 = arith.addf %468, %469 : vector<8x32xf32>
    %cst_190 = arith.constant 0.000000e+00 : f32
    %471 = vector.broadcast %cst_190 : f32 to vector<8x32xf32>
    %472 = arith.maximumf %470, %471 : vector<8x32xf32>
    %cst_191 = arith.constant dense<0.000000e+00> : vector<8x16xf32>
    %473 = tpu.matmul %472, %12, %cst_191 {dimension_numbers = #tpu.dot_dimension_numbers<[1], [0], [0], [1], [0, 0, 1, 1], [], []>} : vector<8x32xf32>, vector<32x16xf32>, vector<8x16xf32> -> vector<8x16xf32>
    %474 = vector.broadcast %13 : vector<1x16xf32> to vector<8x16xf32>
    %475 = arith.addf %473, %474 : vector<8x16xf32>
    %cst_192 = arith.constant dense<0.000000e+00> : vector<8x16xf32>
    %476 = tpu.matmul %462, %14, %cst_192 {dimension_numbers = #tpu.dot_dimension_numbers<[1], [0], [0], [1], [0, 0, 1, 1], [], []>} : vector<8x32xf32>, vector<32x16xf32>, vector<8x16xf32> -> vector<8x16xf32>
    %477 = vector.broadcast %15 : vector<1x16xf32> to vector<8x16xf32>
    %478 = arith.addf %476, %477 : vector<8x16xf32>
    %cst_193 = arith.constant 2.000000e+01 : f32
    %479 = vector.broadcast %cst_193 : f32 to vector<8x16xf32>
    %480 = arith.cmpf ogt, %478, %479 : vector<8x16xf32>
    %cst_194 = arith.constant 2.000000e+01 : f32
    %481 = vector.broadcast %cst_194 : f32 to vector<8x16xf32>
    %482 = arith.minimumf %478, %481 : vector<8x16xf32>
    %483 = math.exp %482 : vector<8x16xf32>
    %484 = math.log1p %483 : vector<8x16xf32>
    %485 = arith.select %480, %478, %484 : vector<8x16xi1>, vector<8x16xf32>
    %cst_195 = arith.constant 0.00999999977 : f32
    %486 = vector.broadcast %cst_195 : f32 to vector<8x16xf32>
    %487 = arith.addf %485, %486 : vector<8x16xf32>
    %488 = arith.index_cast %c8_i32 : i32 to index
    %c0_196 = arith.constant 0 : index
    %c0_197 = arith.constant 0 : index
    %489 = vector.load %arg2[%488, %c0_196, %c0_197] : memref<10x8x1xf32, #tpu.memory_space<vmem>>, vector<1x8x1xf32>
    %490 = vector.shape_cast %489 : vector<1x8x1xf32> to vector<8x1xf32>
    %491 = arith.mulf %490, %2 : vector<8x1xf32>
    %492 = vector.broadcast %1 : vector<8x1xf32> to vector<8x16xf32>
    %493 = arith.mulf %475, %492 : vector<8x16xf32>
    %494 = arith.addf %442, %493 : vector<8x16xf32>
    %495 = vector.broadcast %491 : vector<8x1xf32> to vector<8x16xf32>
    %496 = arith.mulf %487, %495 : vector<8x16xf32>
    %497 = arith.addf %494, %496 : vector<8x16xf32>
    %c1_i32_198 = arith.constant 1 : i32
    %498 = arith.addi %c8_i32, %c1_i32_198 : i32
    %499 = arith.index_cast %498 : i32 to index
    %c0_199 = arith.constant 0 : index
    %c0_200 = arith.constant 0 : index
    %500 = vector.load %arg13[%499, %c0_199, %c0_200] : memref<11x8x16xf32, #tpu.memory_space<vmem>>, vector<1x8x16xf32>
    %501 = vector.shape_cast %500 : vector<1x8x16xf32> to vector<8x16xf32>
    %502 = vector.shape_cast %497 : vector<8x16xf32> to vector<1x8x16xf32>
    tpu.vector_store %arg13[%499, %c0_199, %c0_200], %502 {strides = array<i32>} : memref<11x8x16xf32, #tpu.memory_space<vmem>>, vector<1x8x16xf32>,
    %503 = arith.index_cast %c8_i32 : i32 to index
    %c0_201 = arith.constant 0 : index
    %c0_202 = arith.constant 0 : index
    %504 = vector.load %arg14[%503, %c0_201, %c0_202] : memref<10x8x16xf32, #tpu.memory_space<vmem>>, vector<1x8x16xf32>
    %505 = vector.shape_cast %504 : vector<1x8x16xf32> to vector<8x16xf32>
    %506 = vector.shape_cast %475 : vector<8x16xf32> to vector<1x8x16xf32>
    tpu.vector_store %arg14[%503, %c0_201, %c0_202], %506 {strides = array<i32>} : memref<10x8x16xf32, #tpu.memory_space<vmem>>, vector<1x8x16xf32>,
    %507 = arith.index_cast %c8_i32 : i32 to index
    %c0_203 = arith.constant 0 : index
    %c0_204 = arith.constant 0 : index
    %508 = vector.load %arg15[%507, %c0_203, %c0_204] : memref<10x8x16xf32, #tpu.memory_space<vmem>>, vector<1x8x16xf32>
    %509 = vector.shape_cast %508 : vector<1x8x16xf32> to vector<8x16xf32>
    %510 = vector.shape_cast %487 : vector<8x16xf32> to vector<1x8x16xf32>
    tpu.vector_store %arg15[%507, %c0_203, %c0_204], %510 {strides = array<i32>} : memref<10x8x16xf32, #tpu.memory_space<vmem>>, vector<1x8x16xf32>,
    %c9_i32 = arith.constant 9 : i32
    %cst_205 = arith.constant dense<0.000000e+00> : vector<8x64xf32>
    %511 = tpu.matmul %497, %6, %cst_205 {dimension_numbers = #tpu.dot_dimension_numbers<[1], [0], [0], [1], [0, 0, 1, 1], [], []>} : vector<8x16xf32>, vector<16x64xf32>, vector<8x64xf32> -> vector<8x64xf32>
    %512 = vector.broadcast %7 : vector<1x64xf32> to vector<8x64xf32>
    %513 = arith.addf %511, %512 : vector<8x64xf32>
    %cst_206 = arith.constant 0.000000e+00 : f32
    %514 = vector.broadcast %cst_206 : f32 to vector<8x64xf32>
    %515 = arith.maximumf %513, %514 : vector<8x64xf32>
    %516 = vector.extract_strided_slice %515 {offsets = [0, 0], sizes = [8, 32], strides = [1, 1]} : vector<8x64xf32> to vector<8x32xf32>
    %517 = vector.extract_strided_slice %515 {offsets = [0, 32], sizes = [8, 32], strides = [1, 1]} : vector<8x64xf32> to vector<8x32xf32>
    %cst_207 = arith.constant dense<0.000000e+00> : vector<8x32xf32>
    %518 = tpu.matmul %516, %8, %cst_207 {dimension_numbers = #tpu.dot_dimension_numbers<[1], [0], [0], [1], [0, 0, 1, 1], [], []>} : vector<8x32xf32>, vector<32x32xf32>, vector<8x32xf32> -> vector<8x32xf32>
    %519 = vector.broadcast %9 : vector<1x32xf32> to vector<8x32xf32>
    %520 = arith.addf %518, %519 : vector<8x32xf32>
    %cst_208 = arith.constant 0.000000e+00 : f32
    %521 = vector.broadcast %cst_208 : f32 to vector<8x32xf32>
    %522 = arith.maximumf %520, %521 : vector<8x32xf32>
    %cst_209 = arith.constant dense<0.000000e+00> : vector<8x32xf32>
    %523 = tpu.matmul %522, %10, %cst_209 {dimension_numbers = #tpu.dot_dimension_numbers<[1], [0], [0], [1], [0, 0, 1, 1], [], []>} : vector<8x32xf32>, vector<32x32xf32>, vector<8x32xf32> -> vector<8x32xf32>
    %524 = vector.broadcast %11 : vector<1x32xf32> to vector<8x32xf32>
    %525 = arith.addf %523, %524 : vector<8x32xf32>
    %cst_210 = arith.constant 0.000000e+00 : f32
    %526 = vector.broadcast %cst_210 : f32 to vector<8x32xf32>
    %527 = arith.maximumf %525, %526 : vector<8x32xf32>
    %cst_211 = arith.constant dense<0.000000e+00> : vector<8x16xf32>
    %528 = tpu.matmul %527, %12, %cst_211 {dimension_numbers = #tpu.dot_dimension_numbers<[1], [0], [0], [1], [0, 0, 1, 1], [], []>} : vector<8x32xf32>, vector<32x16xf32>, vector<8x16xf32> -> vector<8x16xf32>
    %529 = vector.broadcast %13 : vector<1x16xf32> to vector<8x16xf32>
    %530 = arith.addf %528, %529 : vector<8x16xf32>
    %cst_212 = arith.constant dense<0.000000e+00> : vector<8x16xf32>
    %531 = tpu.matmul %517, %14, %cst_212 {dimension_numbers = #tpu.dot_dimension_numbers<[1], [0], [0], [1], [0, 0, 1, 1], [], []>} : vector<8x32xf32>, vector<32x16xf32>, vector<8x16xf32> -> vector<8x16xf32>
    %532 = vector.broadcast %15 : vector<1x16xf32> to vector<8x16xf32>
    %533 = arith.addf %531, %532 : vector<8x16xf32>
    %cst_213 = arith.constant 2.000000e+01 : f32
    %534 = vector.broadcast %cst_213 : f32 to vector<8x16xf32>
    %535 = arith.cmpf ogt, %533, %534 : vector<8x16xf32>
    %cst_214 = arith.constant 2.000000e+01 : f32
    %536 = vector.broadcast %cst_214 : f32 to vector<8x16xf32>
    %537 = arith.minimumf %533, %536 : vector<8x16xf32>
    %538 = math.exp %537 : vector<8x16xf32>
    %539 = math.log1p %538 : vector<8x16xf32>
    %540 = arith.select %535, %533, %539 : vector<8x16xi1>, vector<8x16xf32>
    %cst_215 = arith.constant 0.00999999977 : f32
    %541 = vector.broadcast %cst_215 : f32 to vector<8x16xf32>
    %542 = arith.addf %540, %541 : vector<8x16xf32>
    %543 = arith.index_cast %c9_i32 : i32 to index
    %c0_216 = arith.constant 0 : index
    %c0_217 = arith.constant 0 : index
    %544 = vector.load %arg2[%543, %c0_216, %c0_217] : memref<10x8x1xf32, #tpu.memory_space<vmem>>, vector<1x8x1xf32>
    %545 = vector.shape_cast %544 : vector<1x8x1xf32> to vector<8x1xf32>
    %546 = arith.mulf %545, %2 : vector<8x1xf32>
    %547 = vector.broadcast %1 : vector<8x1xf32> to vector<8x16xf32>
    %548 = arith.mulf %530, %547 : vector<8x16xf32>
    %549 = arith.addf %497, %548 : vector<8x16xf32>
    %550 = vector.broadcast %546 : vector<8x1xf32> to vector<8x16xf32>
    %551 = arith.mulf %542, %550 : vector<8x16xf32>
    %552 = arith.addf %549, %551 : vector<8x16xf32>
    %c1_i32_218 = arith.constant 1 : i32
    %553 = arith.addi %c9_i32, %c1_i32_218 : i32
    %554 = arith.index_cast %553 : i32 to index
    %c0_219 = arith.constant 0 : index
    %c0_220 = arith.constant 0 : index
    %555 = vector.load %arg13[%554, %c0_219, %c0_220] : memref<11x8x16xf32, #tpu.memory_space<vmem>>, vector<1x8x16xf32>
    %556 = vector.shape_cast %555 : vector<1x8x16xf32> to vector<8x16xf32>
    %557 = vector.shape_cast %552 : vector<8x16xf32> to vector<1x8x16xf32>
    tpu.vector_store %arg13[%554, %c0_219, %c0_220], %557 {strides = array<i32>} : memref<11x8x16xf32, #tpu.memory_space<vmem>>, vector<1x8x16xf32>,
    %558 = arith.index_cast %c9_i32 : i32 to index
    %c0_221 = arith.constant 0 : index
    %c0_222 = arith.constant 0 : index
    %559 = vector.load %arg14[%558, %c0_221, %c0_222] : memref<10x8x16xf32, #tpu.memory_space<vmem>>, vector<1x8x16xf32>
    %560 = vector.shape_cast %559 : vector<1x8x16xf32> to vector<8x16xf32>
    %561 = vector.shape_cast %530 : vector<8x16xf32> to vector<1x8x16xf32>
    tpu.vector_store %arg14[%558, %c0_221, %c0_222], %561 {strides = array<i32>} : memref<10x8x16xf32, #tpu.memory_space<vmem>>, vector<1x8x16xf32>,
    %562 = arith.index_cast %c9_i32 : i32 to index
    %c0_223 = arith.constant 0 : index
    %c0_224 = arith.constant 0 : index
    %563 = vector.load %arg15[%562, %c0_223, %c0_224] : memref<10x8x16xf32, #tpu.memory_space<vmem>>, vector<1x8x16xf32>
    %564 = vector.shape_cast %563 : vector<1x8x16xf32> to vector<8x16xf32>
    %565 = vector.shape_cast %542 : vector<8x16xf32> to vector<1x8x16xf32>
    tpu.vector_store %arg15[%562, %c0_223, %c0_224], %565 {strides = array<i32>} : memref<10x8x16xf32, #tpu.memory_space<vmem>>, vector<1x8x16xf32>,
    %c10_i32 = arith.constant 10 : i32
    return
  }
}

</mosaic_0001>

<bundles_post_ra>
// kernel: sde_transition_forward.1
= control target key start
LH: loop header
LB: loop body
LE: loop exit
PB: predicated region body
PF: predicated region fallthrough
CT: control target
= control target key end

     0   :  { %21 = vsyncpa [#allocation3], 0  ;;  %v5386_v2 = vmov 0.0|0.0   ;;  %vm5387_vm0 = vmmov 0   ;;  %v5388_v4 = vmov 0.0   ;;  %vm58_vm1 = vcmask 130048   ;;  %s6184_s0 = inlined_call_operand.vmem [shape: f32[8,16], index: 0, kind: input, shape index: {}]   ;;  %s6185_s1 = inlined_call_operand.vmem [shape: f32[8,1], index: 1, kind: input, shape index: {}]   ;;  %s6186_s2 = inlined_call_operand.vmem [shape: f32[10,8,1], index: 2, kind: input, shape index: {}]   ;;  %s6187_s3 = inlined_call_operand.vmem [shape: f32[16,64], index: 3, kind: input, shape index: {}]   ;;  %s6188_s4 = inlined_call_operand.vmem [shape: f32[1,64], index: 4, kind: input, shape index: {}]   ;;  %s6189_s5 = inlined_call_operand.vmem [shape: f32[32,32], index: 5, kind: input, shape index: {}]   ;;  %s6190_s6 = inlined_call_operand.vmem [shape: f32[1,32], index: 6, kind: input, shape index: {}]   ;;  %s6191_s7 = inlined_call_operand.vmem [shape: f32[32,32], index: 7, kind: input, shape index: {}]   ;;  %s6192_s8 = inlined_call_operand.vmem [shape: f32[1,32], index: 8, kind: input, shape index: {}]   ;;  %s6193_s9 = inlined_call_operand.vmem [shape: f32[32,16], index: 9, kind: input, shape index: {}]   ;;  %s6194_s10 = inlined_call_operand.vmem [shape: f32[1,16], index: 10, kind: input, shape index: {}]   ;;  %s6195_s11 = inlined_call_operand.vmem [shape: f32[32,16], index: 11, kind: input, shape index: {}]   ;;  %s6196_s12 = inlined_call_operand.vmem [shape: f32[1,16], index: 12, kind: input, shape index: {}]   ;;  %s6197_s13 = inlined_call_operand.hbm [shape: f32[11,8,16], index: 13, kind: output, shape index: {0}]   ;;  %s6198_s14 = inlined_call_operand.hbm [shape: f32[10,8,16], index: 14, kind: output, shape index: {1}]   ;;  %s6199_s15 = inlined_call_operand.hbm [shape: f32[10,8,16], index: 15, kind: output, shape index: {2}]  }
   0x1   :  { %v60_v0 = vld [vmem:[%s6187_s3] sm:$0xff]  ;;  %v61_v1 = vld [vmem:[%s6187_s3 + $0x8] sm:$0xff]  ;;  %4987 = vmatprep.subr.bf16.mxu0 %v5386_v2  ;;  %4481 = vmatprep.mubr.msk.f32.mxu0 %vm5387_vm0, %v5388_v4 }
   0x2   :  { %v5483_v3 = vpack.c.bf16 %v61_v1, %v60_v0  ;;  %v5490_v5 = vld [vmem:[%s6184_s0] sm:$0xff]  ;;  %v64_v7 = vld [vmem:[%s6189_s5 + $0x8] sm:$0xff]  ;;  %4990 = vmatprep.subr.bf16.mxu1 %v5386_v2  ;;  %4492 = vmatprep.mubr.msk.f32.mxu1 %vm5387_vm0, %v5388_v4 }
   0x3   :  { %v63_v6 = vld [vmem:[%s6189_s5] sm:$0xff]  ;;  %59 = vst.msk [vmem:[#allocation2] sm:$0xff] %vm58_vm1, %v5490_v5 }
   0x4   :  { %v5501_v8 = vpack.c.bf16 %v64_v7, %v63_v6 }
   0x5   :  { %22 = vsyncpa [#allocation5], 0  ;;  %4989 = vmatpush3.bf16.msra.mxu0 %v5483_v3  ;;  %v65_v9 = vld [vmem:[%s6189_s5 + $0x10] sm:$0xff]  ;;  %v66_v10 = vld [vmem:[%s6189_s5 + $0x18] sm:$0xff]  ;;  %vm169_vm2 = vcmask 261120   ;;  %s5389_s20 = smov 96  }
   0x6   :  { %4992 = vmatpush3.bf16.msra.mxu1 %v5501_v8  ;;  %4996 = vmatprep.subr.bf16.mxu0 %v5386_v2  ;;  %v5519_v11 = vpack.c.bf16 %v66_v10, %v65_v9  ;;  %v68_v12 = vld [vmem:[%s6191_s7] sm:$0xff]  ;;  %v69_v13 = vld [vmem:[%s6191_s7 + $0x8] sm:$0xff]  ;;  %v70_v20 = vld [vmem:[%s6191_s7 + $0x10] sm:$0xff]  ;;  %v5390_v25 = vmov 0   ;;  %s5392_s30 = smov [#allocation6]   ;;  %s5393_s17 = smov [#allocation2]  }
   0x7   :  { %4993 = vmatprep.subr.bf16.mxu1 %v5386_v2  ;;  %v5529_v14 = vpack.c.bf16 %v69_v13, %v68_v12  ;;  %v5536_v15 = vld [vmem:[%s6188_s4] ss:$0 sm:$0xff]  ;;  %v71_v21 = vld [vmem:[%s6191_s7 + $0x18] sm:$0xff]  ;;  %5268 = vset.pattern.permute.xlu1 %v5390_v25  ;;  %v74_v26 = vld [vmem:[%s6193_s9 + $0x8] sm:$0xff]  ;;  %s4165_s16 = sshll.u32 %s5392_s30, 4  ;;  %s6129_s18 = sshll.u32 %s5393_s17, 4  ;;  %s6125_s16 = int_to_ptr.vmem [resolvable:$true] %s4165_s16  ;;  %s4142_s18 = int_to_ptr.vmem [resolvable:$true] %s6129_s18 }
   0x8   :  { %4482 = vmatmul.mubr.msk.f32.vlgmr.msra.gmra.mrb[0].mxu0 %vm58_vm1, %v5490_v5  ;;  %v5549_v22 = vpack.c.bf16 %v71_v21, %v70_v20  ;;  %v50_v23 = vld [vmem:[%s6185_s1] sm:$0xff]  ;;  %5267 = vset.pattern.permute.xlu0 %v5390_v25  ;;  %v79_v37 = vld [vmem:[%s6195_s11 + $0x8] sm:$0xff]  ;;  %v80_v43 = vld [vmem:[%s6195_s11 + $0x10] sm:$0xff] }
   0x9   :  { %4503 = vmatprep.mubr.msk.f32.mxu0 %vm5387_vm0, %v5388_v4  ;;  %4998 = vmatpush3.bf16.msra.mxu0 %v5529_v14  ;;  %v73_v24 = vld [vmem:[%s6193_s9] sm:$0xff]  ;;  %5269 = vrsqrt.f32 %v50_v23  ;;  %vm53_vm3 = vcmp.eq.f32.partialorder %v50_v23, inf  ;;  %v56_v29 = vand.u32 2147483648, %v50_v23  ;;  %vm55_vm4 = vcmp.eq.f32.partialorder %v50_v23, 0.0  ;;  %v81_v44 = vld [vmem:[%s6195_s11 + $0x18] sm:$0xff]  ;;  %v75_v47 = vld [vmem:[%s6193_s9 + $0x10] sm:$0xff] }
   0xa   :  { %4995 = vmatpush3.bf16.msra.mxu1 %v5519_v11  ;;  %4999 = vmatprep.subr.bf16.mxu0 %v5386_v2  ;;  %v5562_v27 = vpack.c.bf16 %v74_v26, %v73_v24  ;;  %v498_v31 = vld [vmem:[%s6186_s2] sm:$0xff]  ;;  %v5594_v45 = vpack.c.bf16 %v81_v44, %v80_v43  ;;  %v76_v48 = vld [vmem:[%s6193_s9 + $0x18] sm:$0xff]  ;;  %v4228_v44 = vld [vmem:[%s6186_s2 + $0x30] sm:$0xff] }
   0xb   :  { %5002 = vmatprep.subr.bf16.mxu1 %v5386_v2  ;;  %v5575_v35 = vld [vmem:[%s6190_s6] ss:$0 sm:$0xff]  ;;  %v5614_v49 = vpack.c.bf16 %v76_v48, %v75_v47  ;;  %v4234_v47 = vld [vmem:[%s6186_s2 + $0x38] sm:$0xff] }
   0xc   :  { %v78_v36 = vld [vmem:[%s6195_s11] sm:$0xff] }
   0xd   :  { %5001 = vmatpush3.bf16.msra.mxu0 %v5549_v22  ;;  %v5584_v41 = vpack.c.bf16 %v79_v37, %v78_v36  ;;  %v5621_v50 = vld [vmem:[%s6192_s8] ss:$0 sm:$0xff]  ;;  %v4210_v37 = vld [vmem:[%s6186_s2 + $0x18] sm:$0xff] }
   0xe   :  { %5008 = vmatprep.subr.bf16.mxu0 %v5386_v2  ;;  %v5628_v55 = vld [vmem:[%s6196_s12] ss:$0 sm:$0xff] }
  0x13   :  { %v5270_v28 = vpop.eup %5269 }
  0x14   :  { %v52_v30 = vmul.f32 %v5270_v28, %v50_v23 }
  0x16   :  { %v54_v32 = vsel %vm53_vm3, %v50_v23, %v52_v30  ;;  %v4198_v30 = vld [vmem:[%s6186_s2 + $0x8] sm:$0xff] }
  0x17   :  { %v5569_v33 = vsel %vm55_vm4, %v56_v29, %v54_v32 }
  0x18   :  { %v499_v34 = vmul.f32 %v498_v31, %v5569_v33  ;;  %v904_v32 = vmul.f32 %v4198_v30, %v5569_v33  ;;  %v3316_v48 = vmul.f32 %v4234_v47, %v5569_v33 }
  0x1a   :  { %509 = vperm.xlu1 %5268, %v499_v34   ;;  %v4204_v34 = vld [vmem:[%s6186_s2 + $0x10] sm:$0xff] }
  0x1b   :  { %v1306_v36 = vmul.f32 %v4204_v34, %v5569_v33 }
  0x99   :  { %v510_v21 = vpop.permute.xlu1 %509 }
  0xdb   :  { %v158_v16 = vpop.f32.mrb[0].mxu0 }
  0xdc   :  { %v159_v17 = vadd.f32 %v5536_v15, %v158_v16  ;;  %v4483_v18 = vpop.f32.mrb[1].mxu0  ;;  %v5639_v16 = vld [vmem:[%s6194_s10] ss:$0 sm:$0xff] }
  0xde   :  { %v162_v19 = vmax.f32 %v159_v17, 0.0 }
  0xe0   :  { %409 = vrot.lane.b32.xlu0 %v162_v19, %s5389_s20  ;;  %4493 = vmatmul.mubr.msk.f32.vlgmr.msra.gmra.mrb[0].mxu1 %vm169_vm2, %v162_v19 }
  0xe1   :  { %4514 = vmatprep.mubr.msk.f32.mxu1 %vm5387_vm0, %v5388_v4  ;;  %5004 = vmatpush3.bf16.msra.mxu1 %v5562_v27 }
  0xe2   :  { %5005 = vmatprep.subr.bf16.mxu1 %v5386_v2 }
  0xe4   :  { %502 = vperm.xlu0 %5267, %v50_v23  }
  0xe5   :  { %5007 = vmatpush3.bf16.msra.mxu1 %v5614_v49 }
  0xe6   :  { %5014 = vmatprep.subr.bf16.mxu1 %v5386_v2 }
 0x152   :  { %v410_v46 = vpop.permute.xlu0 %409 }
 0x163   :  { %v5641_v18 = vpop.permute.xlu0 %502 }
 0x1b3   :  { %v239_v38 = vpop.f32.mrb[0].mxu1 }
 0x1b4   :  { %v240_v39 = vadd.f32 %v5575_v35, %v239_v38  ;;  %v4494_v40 = vpop.f32.mrb[1].mxu1  ;;  %v1708_v38 = vmul.f32 %v4210_v37, %v5569_v33 }
 0x1b6   :  { %v243_v42 = vmax.f32 %v240_v39, 0.0  ;;  %v4216_v39 = vld [vmem:[%s6186_s2 + $0x20] sm:$0xff] }
 0x1b7   :  { %v2110_v40 = vmul.f32 %v4216_v39, %v5569_v33 }
 0x1b8   :  { %4504 = vmatmul.mubr.msk.f32.vlgmr.msra.gmra.mrb[2].mxu0 %vm169_vm2, %v243_v42  ;;  %v4222_v42 = vld [vmem:[%s6186_s2 + $0x28] sm:$0xff] }
 0x1b9   :  { %5010 = vmatpush3.bf16.msra.mxu0 %v5584_v41  ;;  %4525 = vmatprep.mubr.msk.f32.mxu0 %vm5387_vm0, %v5388_v4  ;;  %v2512_v43 = vmul.f32 %v4222_v42, %v5569_v33 }
 0x1ba   :  { %5011 = vmatprep.subr.bf16.mxu0 %v5386_v2 }
 0x1bd   :  { %5013 = vmatpush3.bf16.msra.mxu0 %v5594_v45 }
 0x1be   :  { %5017 = vmatprep.subr.bf16.mxu0 %v5386_v2 }
 0x1c0   :  { %4526 = vmatmul.mubr.msk.f32.vlgmr.msra.gmra.mrb[4].mxu0 %vm169_vm2, %v410_v46  ;;  %v2914_v46 = vmul.f32 %v4228_v44, %v5569_v33 }
 0x1c1   :  { %5019 = vmatpush3.bf16.msra.mxu0 %v5501_v8  ;;  %4543 = vmatprep.mubr.msk.f32.mxu0 %vm5387_vm0, %v5388_v4 }
 0x1c2   :  { %5020 = vmatprep.subr.bf16.mxu0 %v5386_v2 }
 0x1c5   :  { %5022 = vmatpush3.bf16.msra.mxu0 %v5519_v11 }
 0x1c6   :  { %5029 = vmatprep.subr.bf16.mxu0 %v5386_v2 }
 0x28b   :  { %v319_v51 = vpop.f32.mrb[2].mxu0 }
 0x28c   :  { %v320_v52 = vadd.f32 %v5621_v50, %v319_v51  ;;  %v4505_v53 = vpop.f32.mrb[3].mxu0  ;;  %v4240_v51 = vld [vmem:[%s6186_s2 + $0x40] sm:$0xff] }
 0x28d   :  { %v4246_v53 = vld [vmem:[%s6186_s2 + $0x48] sm:$0xff] }
 0x28e   :  { %v323_v54 = vmax.f32 %v320_v52, 0.0  ;;  %v3718_v52 = vmul.f32 %v4240_v51, %v5569_v33 }
 0x290   :  { %4515 = vmatmul.mubr.msk.f32.vlgmr.msra.gmra.mrb[2].mxu1 %vm169_vm2, %v323_v54  ;;  %v4120_v54 = vmul.f32 %v4246_v53, %v5569_v33 }
 0x291   :  { %5016 = vmatpush3.bf16.msra.mxu1 %v5483_v3  ;;  %4532 = vmatprep.mubr.msk.f32.mxu1 %vm5387_vm0, %v5388_v4 }
 0x292   :  { %5023 = vmatprep.subr.bf16.mxu1 %v5386_v2 }
 0x293   :  { %v479_v56 = vpop.f32.mrb[4].mxu0 }
 0x294   :  { %v480_v57 = vadd.f32 %v5628_v55, %v479_v56  ;;  %v4527_v58 = vpop.f32.mrb[5].mxu0 }
 0x296   :  { %v484_v59 = vmin.f32 %v480_v57, 20.0  ;;  %vm483_vm6 = vcmp.gt.f32.partialorder %v480_v57, 20.0 }
 0x298   :  { %v485_v60 = vmul.f32 1.442695, %v484_v59 }
 0x29a   :  { %5271 = vpow2.f32 %v485_v60 }
 0x2a4   :  { %v5272_v61 = vpop.eup %5271 }
 0x2a5   :  { %v487_v62 = vadd.f32 1.0, %v5272_v61  ;;  %v490_v63 = vmul.f32 -0.5, %v5272_v61  ;;  %v493_v1 = vand.u32 2147483647, %v5272_v61 }
 0x2a7   :  { %5273 = vlog2.f32 %v487_v62  ;;  %v491_v0 = vadd.f32 1.0, %v490_v63  ;;  %vm494_vm5 = vcmp.lt.f32.partialorder %v493_v1, 0.0004427343 }
 0x2a9   :  { %v492_v9 = vmul.f32 %v5272_v61, %v491_v0 }
 0x2b1   :  { %v5274_v6 = vpop.eup %5273 }
 0x2b2   :  { %v489_v7 = vmul.f32 0.6931472, %v5274_v6 }
 0x2b4   :  { %v495_v10 = vsel %vm494_vm5, %v492_v9, %v489_v7 }
 0x2b5   :  { %v496_v12 = vsel %vm483_vm6, %v480_v57, %v495_v10 }
 0x2b6   :  { %v497_v13 = vadd.f32 0.01, %v496_v12 }
 0x2b8   :  { %517 = vst.msk [vmem:[#allocation6] sm:$0xff] %vm58_vm1, %v497_v13  ;;  %v512_v24 = vmul.f32 %v510_v21, %v497_v13 }
 0x363   :  { %v399_v17 = vpop.f32.mrb[2].mxu1 }
 0x364   :  { %v400_v19 = vadd.f32 %v5639_v16, %v399_v17  ;;  %v4516_v20 = vpop.f32.mrb[3].mxu1 }
 0x366   :  { %516 = vst.msk [vmem:[#allocation4] sm:$0xff] %vm58_vm1, %v400_v19  ;;  %v505_v23 = vmul.f32 %v5641_v18, %v400_v19 }
 0x368   :  { %v506_v25 = vadd.f32 %v505_v23, %v5490_v5 }
 0x36a   :  { %v5647_v26 = vadd.f32 %v512_v24, %v506_v25 }
 0x36c   :  { %515 = vst.msk [vmem:[#allocation2 + $0x8] sm:$0xff] %vm58_vm1, %v5647_v26  ;;  %4533 = vmatmul.mubr.msk.f32.vlgmr.msra.gmra.mrb[4].mxu1 %vm58_vm1, %v5647_v26 }
 0x36d   :  { %5025 = vmatpush3.bf16.msra.mxu1 %v5529_v14  ;;  %4554 = vmatprep.mubr.msk.f32.mxu1 %vm5387_vm0, %v5388_v4 }
 0x36e   :  { %5026 = vmatprep.subr.bf16.mxu1 %v5386_v2 }
 0x371   :  { %5028 = vmatpush3.bf16.msra.mxu1 %v5549_v22 }
 0x372   :  { %5035 = vmatprep.subr.bf16.mxu1 %v5386_v2 }
 0x43f   :  { %v587_v5 = vpop.f32.mrb[4].mxu1 }
 0x440   :  { %v588_v28 = vadd.f32 %v5536_v15, %v587_v5  ;;  %v4534_v29 = vpop.f32.mrb[5].mxu1 }
 0x442   :  { %v591_v31 = vmax.f32 %v588_v28, 0.0 }
 0x444   :  { %813 = vrot.lane.b32.xlu1 %v591_v31, %s5389_s20  ;;  %4544 = vmatmul.mubr.msk.f32.vlgmr.msra.gmra.mrb[6].mxu0 %vm169_vm2, %v591_v31 }
 0x445   :  { %5031 = vmatpush3.bf16.msra.mxu0 %v5562_v27  ;;  %4565 = vmatprep.mubr.msk.f32.mxu0 %vm5387_vm0, %v5388_v4 }
 0x446   :  { %5032 = vmatprep.subr.bf16.mxu0 %v5386_v2 }
 0x448   :  { %909 = vperm.xlu1 %5268, %v904_v32  }
 0x449   :  { %5034 = vmatpush3.bf16.msra.mxu0 %v5614_v49 }
 0x44a   :  { %5041 = vmatprep.subr.bf16.mxu0 %v5386_v2 }
 0x44c   :  { %1311 = vperm.xlu1 %5268, %v1306_v36  }
 0x450   :  { %1713 = vperm.xlu1 %5268, %v1708_v38  }
 0x454   :  { %2115 = vperm.xlu1 %5268, %v2110_v40  }
 0x458   :  { %2517 = vperm.xlu1 %5268, %v2512_v43  }
 0x45c   :  { %2919 = vperm.xlu1 %5268, %v2914_v46  }
 0x460   :  { %3321 = vperm.xlu1 %5268, %v3316_v48  }
 0x464   :  { %3723 = vperm.xlu1 %5268, %v3718_v52  }
 0x468   :  { %4125 = vperm.xlu1 %5268, %v4120_v54  }
 0x4b6   :  { %v814_v33 = vpop.permute.xlu1 %813 }
 0x4c7   :  { %v910_v32 = vpop.permute.xlu1 %909 }
 0x517   :  { %v661_v56 = vpop.f32.mrb[6].mxu0 }
 0x518   :  { %v662_v57 = vadd.f32 %v5575_v35, %v661_v56  ;;  %v4545_v58 = vpop.f32.mrb[7].mxu0 }
 0x51a   :  { %v665_v59 = vmax.f32 %v662_v57, 0.0 }
 0x51c   :  { %4555 = vmatmul.mubr.msk.f32.vlgmr.msra.gmra.mrb[6].mxu1 %vm169_vm2, %v665_v59 }
 0x51d   :  { %5037 = vmatpush3.bf16.msra.mxu1 %v5584_v41  ;;  %4576 = vmatprep.mubr.msk.f32.mxu1 %vm5387_vm0, %v5388_v4 }
 0x51e   :  { %5038 = vmatprep.subr.bf16.mxu1 %v5386_v2 }
 0x521   :  { %5040 = vmatpush3.bf16.msra.mxu1 %v5594_v45 }
 0x522   :  { %5044 = vmatprep.subr.bf16.mxu1 %v5386_v2 }
 0x524   :  { %4577 = vmatmul.mubr.msk.f32.vlgmr.msra.gmra.mrb[8].mxu1 %vm169_vm2, %v814_v33 }
 0x525   :  { %5046 = vmatpush3.bf16.msra.mxu1 %v5501_v8  ;;  %4594 = vmatprep.mubr.msk.f32.mxu1 %vm5387_vm0, %v5388_v4 }
 0x526   :  { %5047 = vmatprep.subr.bf16.mxu1 %v5386_v2 }
 0x529   :  { %5049 = vmatpush3.bf16.msra.mxu1 %v5519_v11 }
 0x52a   :  { %5056 = vmatprep.subr.bf16.mxu1 %v5386_v2 }
 0x5ef   :  { %v735_v60 = vpop.f32.mrb[6].mxu1 }
 0x5f0   :  { %v736_v61 = vadd.f32 %v5621_v50, %v735_v60  ;;  %v4556_v62 = vpop.f32.mrb[7].mxu1 }
 0x5f2   :  { %v739_v63 = vmax.f32 %v736_v61, 0.0 }
 0x5f4   :  { %4566 = vmatmul.mubr.msk.f32.vlgmr.msra.gmra.mrb[8].mxu0 %vm169_vm2, %v739_v63 }
 0x5f5   :  { %5043 = vmatpush3.bf16.msra.mxu0 %v5483_v3  ;;  %4583 = vmatprep.mubr.msk.f32.mxu0 %vm5387_vm0, %v5388_v4 }
 0x5f6   :  { %5050 = vmatprep.subr.bf16.mxu0 %v5386_v2 }
 0x5f7   :  { %v883_v0 = vpop.f32.mrb[8].mxu1 }
 0x5f8   :  { %v884_v1 = vadd.f32 %v5628_v55, %v883_v0  ;;  %v4578_v6 = vpop.f32.mrb[9].mxu1 }
 0x5fa   :  { %v888_v7 = vmin.f32 %v884_v1, 20.0  ;;  %vm887_vm8 = vcmp.gt.f32.partialorder %v884_v1, 20.0 }
 0x5fc   :  { %v889_v9 = vmul.f32 1.442695, %v888_v7 }
 0x5fe   :  { %5275 = vpow2.f32 %v889_v9 }
 0x608   :  { %v5276_v10 = vpop.eup %5275 }
 0x609   :  { %v891_v12 = vadd.f32 1.0, %v5276_v10  ;;  %v894_v13 = vmul.f32 -0.5, %v5276_v10  ;;  %v897_v19 = vand.u32 2147483647, %v5276_v10 }
 0x60b   :  { %5277 = vlog2.f32 %v891_v12  ;;  %v895_v17 = vadd.f32 1.0, %v894_v13  ;;  %vm898_vm7 = vcmp.lt.f32.partialorder %v897_v19, 0.0004427343 }
 0x60d   :  { %v896_v23 = vmul.f32 %v5276_v10, %v895_v17 }
 0x615   :  { %v5278_v20 = vpop.eup %5277 }
 0x616   :  { %v893_v21 = vmul.f32 0.6931472, %v5278_v20  ;;  %v1312_v20 = vpop.permute.xlu1 %1311 }
 0x618   :  { %v899_v24 = vsel %vm898_vm7, %v896_v23, %v893_v21 }
 0x619   :  { %v900_v25 = vsel %vm887_vm8, %v884_v1, %v899_v24 }
 0x61a   :  { %v901_v5 = vadd.f32 0.01, %v900_v25 }
 0x61c   :  { %919 = vst.msk [vmem:[#allocation6 + $0x8] sm:$0xff] %vm58_vm1, %v901_v5  ;;  %v912_v34 = vmul.f32 %v910_v32, %v901_v5 }
 0x6c7   :  { %v809_v28 = vpop.f32.mrb[8].mxu0 }
 0x6c8   :  { %v810_v29 = vadd.f32 %v5639_v16, %v809_v28  ;;  %v4567_v30 = vpop.f32.mrb[9].mxu0 }
 0x6ca   :  { %v905_v31 = vmul.f32 %v810_v29, %v5641_v18  ;;  %917 = vst.msk [vmem:[#allocation4 + $0x8] sm:$0xff] %vm58_vm1, %v810_v29 }
 0x6cc   :  { %v906_v36 = vadd.f32 %v905_v31, %v5647_v26 }
 0x6ce   :  { %v5731_v37 = vadd.f32 %v912_v34, %v906_v36 }
 0x6d0   :  { %915 = vst.msk [vmem:[#allocation2 + $0x10] sm:$0xff] %vm58_vm1, %v5731_v37  ;;  %4584 = vmatmul.mubr.msk.f32.vlgmr.msra.gmra.mrb[10].mxu0 %vm58_vm1, %v5731_v37 }
 0x6d1   :  { %5052 = vmatpush3.bf16.msra.mxu0 %v5529_v14  ;;  %4605 = vmatprep.mubr.msk.f32.mxu0 %vm5387_vm0, %v5388_v4 }
 0x6d2   :  { %5053 = vmatprep.subr.bf16.mxu0 %v5386_v2 }
 0x6d5   :  { %5055 = vmatpush3.bf16.msra.mxu0 %v5549_v22 }
 0x6d6   :  { %5062 = vmatprep.subr.bf16.mxu0 %v5386_v2 }
 0x7a3   :  { %v989_v26 = vpop.f32.mrb[10].mxu0 }
 0x7a4   :  { %v990_v38 = vadd.f32 %v5536_v15, %v989_v26  ;;  %v4585_v39 = vpop.f32.mrb[11].mxu0 }
 0x7a6   :  { %v993_v40 = vmax.f32 %v990_v38, 0.0 }
 0x7a8   :  { %1215 = vrot.lane.b32.xlu0 %v993_v40, %s5389_s20  ;;  %4595 = vmatmul.mubr.msk.f32.vlgmr.msra.gmra.mrb[10].mxu1 %vm169_vm2, %v993_v40 }
 0x7a9   :  { %5058 = vmatpush3.bf16.msra.mxu1 %v5562_v27  ;;  %4616 = vmatprep.mubr.msk.f32.mxu1 %vm5387_vm0, %v5388_v4 }
 0x7aa   :  { %5059 = vmatprep.subr.bf16.mxu1 %v5386_v2 }
 0x7ad   :  { %5061 = vmatpush3.bf16.msra.mxu1 %v5614_v49 }
 0x7ae   :  { %5068 = vmatprep.subr.bf16.mxu1 %v5386_v2 }
 0x81a   :  { %v1216_v47 = vpop.permute.xlu0 %1215 }
 0x87b   :  { %v1063_v42 = vpop.f32.mrb[10].mxu1 }
 0x87c   :  { %v1064_v43 = vadd.f32 %v5575_v35, %v1063_v42  ;;  %v4596_v44 = vpop.f32.mrb[11].mxu1 }
 0x87e   :  { %v1067_v46 = vmax.f32 %v1064_v43, 0.0 }
 0x880   :  { %4606 = vmatmul.mubr.msk.f32.vlgmr.msra.gmra.mrb[12].mxu0 %vm169_vm2, %v1067_v46 }
 0x881   :  { %5064 = vmatpush3.bf16.msra.mxu0 %v5584_v41  ;;  %4627 = vmatprep.mubr.msk.f32.mxu0 %vm5387_vm0, %v5388_v4 }
 0x882   :  { %5065 = vmatprep.subr.bf16.mxu0 %v5386_v2 }
 0x885   :  { %5067 = vmatpush3.bf16.msra.mxu0 %v5594_v45 }
 0x886   :  { %5071 = vmatprep.subr.bf16.mxu0 %v5386_v2 }
 0x888   :  { %4628 = vmatmul.mubr.msk.f32.vlgmr.msra.gmra.mrb[14].mxu0 %vm169_vm2, %v1216_v47 }
 0x889   :  { %5073 = vmatpush3.bf16.msra.mxu0 %v5501_v8  ;;  %4645 = vmatprep.mubr.msk.f32.mxu0 %vm5387_vm0, %v5388_v4 }
 0x88a   :  { %5074 = vmatprep.subr.bf16.mxu0 %v5386_v2 }
 0x88d   :  { %5076 = vmatpush3.bf16.msra.mxu0 %v5519_v11 }
 0x88e   :  { %5083 = vmatprep.subr.bf16.mxu0 %v5386_v2 }
 0x953   :  { %v1137_v48 = vpop.f32.mrb[12].mxu0 }
 0x954   :  { %v1138_v51 = vadd.f32 %v5621_v50, %v1137_v48  ;;  %v4607_v52 = vpop.f32.mrb[13].mxu0 }
 0x956   :  { %v1141_v53 = vmax.f32 %v1138_v51, 0.0 }
 0x958   :  { %4617 = vmatmul.mubr.msk.f32.vlgmr.msra.gmra.mrb[12].mxu1 %vm169_vm2, %v1141_v53 }
 0x959   :  { %5070 = vmatpush3.bf16.msra.mxu1 %v5483_v3  ;;  %4634 = vmatprep.mubr.msk.f32.mxu1 %vm5387_vm0, %v5388_v4 }
 0x95a   :  { %5077 = vmatprep.subr.bf16.mxu1 %v5386_v2 }
 0x95b   :  { %v1285_v54 = vpop.f32.mrb[14].mxu0 }
 0x95c   :  { %v1286_v56 = vadd.f32 %v5628_v55, %v1285_v54  ;;  %v4629_v57 = vpop.f32.mrb[15].mxu0 }
 0x95e   :  { %v1290_v58 = vmin.f32 %v1286_v56, 20.0  ;;  %vm1289_vm10 = vcmp.gt.f32.partialorder %v1286_v56, 20.0 }
 0x960   :  { %v1291_v59 = vmul.f32 1.442695, %v1290_v58 }
 0x962   :  { %5279 = vpow2.f32 %v1291_v59 }
 0x96c   :  { %v5280_v33 = vpop.eup %5279 }
 0x96d   :  { %v1293_v60 = vadd.f32 1.0, %v5280_v33  ;;  %v1296_v61 = vmul.f32 -0.5, %v5280_v33  ;;  %v1299_v63 = vand.u32 2147483647, %v5280_v33 }
 0x96f   :  { %5281 = vlog2.f32 %v1293_v60  ;;  %v1297_v62 = vadd.f32 1.0, %v1296_v61  ;;  %vm1300_vm9 = vcmp.lt.f32.partialorder %v1299_v63, 0.0004427343 }
 0x971   :  { %v1298_v6 = vmul.f32 %v5280_v33, %v1297_v62 }
 0x979   :  { %v5282_v0 = vpop.eup %5281 }
 0x97a   :  { %v1295_v1 = vmul.f32 0.6931472, %v5282_v0  ;;  %v1714_v0 = vpop.permute.xlu1 %1713 }
 0x97c   :  { %v1301_v7 = vsel %vm1300_vm9, %v1298_v6, %v1295_v1 }
 0x97d   :  { %v1302_v9 = vsel %vm1289_vm10, %v1286_v56, %v1301_v7 }
 0x97e   :  { %v1303_v10 = vadd.f32 0.01, %v1302_v9 }
 0x980   :  { %1321 = vst.msk [vmem:[#allocation6 + $0x10] sm:$0xff] %vm58_vm1, %v1303_v10  ;;  %v1314_v21 = vmul.f32 %v1312_v20, %v1303_v10 }
 0xa2b   :  { %v1211_v12 = vpop.f32.mrb[12].mxu1 }
 0xa2c   :  { %v1212_v13 = vadd.f32 %v5639_v16, %v1211_v12  ;;  %v4618_v17 = vpop.f32.mrb[13].mxu1 }
 0xa2e   :  { %v1307_v19 = vmul.f32 %v1212_v13, %v5641_v18  ;;  %1319 = vst.msk [vmem:[#allocation4 + $0x10] sm:$0xff] %vm58_vm1, %v1212_v13 }
 0xa30   :  { %v1308_v23 = vadd.f32 %v1307_v19, %v5731_v37 }
 0xa32   :  { %v5779_v24 = vadd.f32 %v1314_v21, %v1308_v23 }
 0xa34   :  { %1317 = vst.msk [vmem:[#allocation2 + $0x18] sm:$0xff] %vm58_vm1, %v5779_v24  ;;  %4635 = vmatmul.mubr.msk.f32.vlgmr.msra.gmra.mrb[14].mxu1 %vm58_vm1, %v5779_v24 }
 0xa35   :  { %5079 = vmatpush3.bf16.msra.mxu1 %v5529_v14  ;;  %4656 = vmatprep.mubr.msk.f32.mxu1 %vm5387_vm0, %v5388_v4 }
 0xa36   :  { %5080 = vmatprep.subr.bf16.mxu1 %v5386_v2 }
 0xa39   :  { %5082 = vmatpush3.bf16.msra.mxu1 %v5549_v22 }
 0xa3a   :  { %5089 = vmatprep.subr.bf16.mxu1 %v5386_v2 }
 0xb07   :  { %v1391_v25 = vpop.f32.mrb[14].mxu1 }
 0xb08   :  { %v1392_v5 = vadd.f32 %v5536_v15, %v1391_v25  ;;  %v4636_v28 = vpop.f32.mrb[15].mxu1 }
 0xb0a   :  { %v1395_v29 = vmax.f32 %v1392_v5, 0.0 }
 0xb0c   :  { %1617 = vrot.lane.b32.xlu0 %v1395_v29, %s5389_s20  ;;  %4646 = vmatmul.mubr.msk.f32.vlgmr.msra.gmra.mrb[16].mxu0 %vm169_vm2, %v1395_v29 }
 0xb0d   :  { %5085 = vmatpush3.bf16.msra.mxu0 %v5562_v27  ;;  %4667 = vmatprep.mubr.msk.f32.mxu0 %vm5387_vm0, %v5388_v4 }
 0xb0e   :  { %5086 = vmatprep.subr.bf16.mxu0 %v5386_v2 }
 0xb11   :  { %5088 = vmatpush3.bf16.msra.mxu0 %v5614_v49 }
 0xb12   :  { %5095 = vmatprep.subr.bf16.mxu0 %v5386_v2 }
 0xb7e   :  { %v1618_v36 = vpop.permute.xlu0 %1617 }
 0xbdf   :  { %v1465_v30 = vpop.f32.mrb[16].mxu0 }
 0xbe0   :  { %v1466_v31 = vadd.f32 %v5575_v35, %v1465_v30  ;;  %v4647_v32 = vpop.f32.mrb[17].mxu0 }
 0xbe2   :  { %v1469_v34 = vmax.f32 %v1466_v31, 0.0 }
 0xbe4   :  { %4657 = vmatmul.mubr.msk.f32.vlgmr.msra.gmra.mrb[16].mxu1 %vm169_vm2, %v1469_v34 }
 0xbe5   :  { %5091 = vmatpush3.bf16.msra.mxu1 %v5584_v41  ;;  %4678 = vmatprep.mubr.msk.f32.mxu1 %vm5387_vm0, %v5388_v4 }
 0xbe6   :  { %5092 = vmatprep.subr.bf16.mxu1 %v5386_v2 }
 0xbe9   :  { %5094 = vmatpush3.bf16.msra.mxu1 %v5594_v45 }
 0xbea   :  { %5098 = vmatprep.subr.bf16.mxu1 %v5386_v2 }
 0xbec   :  { %4679 = vmatmul.mubr.msk.f32.vlgmr.msra.gmra.mrb[18].mxu1 %vm169_vm2, %v1618_v36 }
 0xbed   :  { %5100 = vmatpush3.bf16.msra.mxu1 %v5501_v8  ;;  %4696 = vmatprep.mubr.msk.f32.mxu1 %vm5387_vm0, %v5388_v4 }
 0xbee   :  { %5101 = vmatprep.subr.bf16.mxu1 %v5386_v2 }
 0xbf1   :  { %5103 = vmatpush3.bf16.msra.mxu1 %v5519_v11 }
 0xbf2   :  { %5110 = vmatprep.subr.bf16.mxu1 %v5386_v2 }
 0xcb7   :  { %v1539_v37 = vpop.f32.mrb[16].mxu1 }
 0xcb8   :  { %v1540_v26 = vadd.f32 %v5621_v50, %v1539_v37  ;;  %v4658_v38 = vpop.f32.mrb[17].mxu1 }
 0xcba   :  { %v1543_v39 = vmax.f32 %v1540_v26, 0.0 }
 0xcbc   :  { %4668 = vmatmul.mubr.msk.f32.vlgmr.msra.gmra.mrb[18].mxu0 %vm169_vm2, %v1543_v39 }
 0xcbd   :  { %5097 = vmatpush3.bf16.msra.mxu0 %v5483_v3  ;;  %4685 = vmatprep.mubr.msk.f32.mxu0 %vm5387_vm0, %v5388_v4 }
 0xcbe   :  { %5104 = vmatprep.subr.bf16.mxu0 %v5386_v2 }
 0xcbf   :  { %v1687_v40 = vpop.f32.mrb[18].mxu1 }
 0xcc0   :  { %v1688_v42 = vadd.f32 %v5628_v55, %v1687_v40  ;;  %v4680_v43 = vpop.f32.mrb[19].mxu1 }
 0xcc2   :  { %v1692_v44 = vmin.f32 %v1688_v42, 20.0  ;;  %vm1691_vm12 = vcmp.gt.f32.partialorder %v1688_v42, 20.0 }
 0xcc4   :  { %v1693_v46 = vmul.f32 1.442695, %v1692_v44 }
 0xcc6   :  { %5283 = vpow2.f32 %v1693_v46 }
 0xcd0   :  { %v5284_v47 = vpop.eup %5283 }
 0xcd1   :  { %v1695_v48 = vadd.f32 1.0, %v5284_v47  ;;  %v1698_v51 = vmul.f32 -0.5, %v5284_v47  ;;  %v1701_v53 = vand.u32 2147483647, %v5284_v47 }
 0xcd3   :  { %5285 = vlog2.f32 %v1695_v48  ;;  %v1699_v52 = vadd.f32 1.0, %v1698_v51  ;;  %vm1702_vm11 = vcmp.lt.f32.partialorder %v1701_v53, 0.0004427343 }
 0xcd5   :  { %v1700_v57 = vmul.f32 %v5284_v47, %v1699_v52 }
 0xcdd   :  { %v5286_v54 = vpop.eup %5285 }
 0xcde   :  { %v1697_v56 = vmul.f32 0.6931472, %v5286_v54  ;;  %v2116_v54 = vpop.permute.xlu1 %2115 }
 0xce0   :  { %v1703_v58 = vsel %vm1702_vm11, %v1700_v57, %v1697_v56 }
 0xce1   :  { %v1704_v59 = vsel %vm1691_vm12, %v1688_v42, %v1703_v58 }
 0xce2   :  { %v1705_v33 = vadd.f32 0.01, %v1704_v59 }
 0xce4   :  { %1723 = vst.msk [vmem:[#allocation6 + $0x18] sm:$0xff] %vm58_vm1, %v1705_v33  ;;  %v1716_v1 = vmul.f32 %v1714_v0, %v1705_v33 }
 0xd8f   :  { %v1613_v60 = vpop.f32.mrb[18].mxu0 }
 0xd90   :  { %v1614_v61 = vadd.f32 %v5639_v16, %v1613_v60  ;;  %v4669_v62 = vpop.f32.mrb[19].mxu0 }
 0xd92   :  { %v1709_v63 = vmul.f32 %v1614_v61, %v5641_v18  ;;  %1721 = vst.msk [vmem:[#allocation4 + $0x18] sm:$0xff] %vm58_vm1, %v1614_v61 }
 0xd94   :  { %v1710_v6 = vadd.f32 %v1709_v63, %v5779_v24 }
 0xd96   :  { %v5827_v7 = vadd.f32 %v1716_v1, %v1710_v6 }
 0xd98   :  { %1719 = vst.msk [vmem:[#allocation2 + $0x20] sm:$0xff] %vm58_vm1, %v5827_v7  ;;  %4686 = vmatmul.mubr.msk.f32.vlgmr.msra.gmra.mrb[20].mxu0 %vm58_vm1, %v5827_v7 }
 0xd99   :  { %5106 = vmatpush3.bf16.msra.mxu0 %v5529_v14  ;;  %4707 = vmatprep.mubr.msk.f32.mxu0 %vm5387_vm0, %v5388_v4 }
 0xd9a   :  { %5107 = vmatprep.subr.bf16.mxu0 %v5386_v2 }
 0xd9d   :  { %5109 = vmatpush3.bf16.msra.mxu0 %v5549_v22 }
 0xd9e   :  { %5116 = vmatprep.subr.bf16.mxu0 %v5386_v2 }
 0xe6b   :  { %v1793_v9 = vpop.f32.mrb[20].mxu0 }
 0xe6c   :  { %v1794_v10 = vadd.f32 %v5536_v15, %v1793_v9  ;;  %v4687_v12 = vpop.f32.mrb[21].mxu0 }
 0xe6e   :  { %v1797_v13 = vmax.f32 %v1794_v10, 0.0 }
 0xe70   :  { %2019 = vrot.lane.b32.xlu0 %v1797_v13, %s5389_s20  ;;  %4697 = vmatmul.mubr.msk.f32.vlgmr.msra.gmra.mrb[20].mxu1 %vm169_vm2, %v1797_v13 }
 0xe71   :  { %5112 = vmatpush3.bf16.msra.mxu1 %v5562_v27  ;;  %4718 = vmatprep.mubr.msk.f32.mxu1 %vm5387_vm0, %v5388_v4 }
 0xe72   :  { %5113 = vmatprep.subr.bf16.mxu1 %v5386_v2 }
 0xe75   :  { %5115 = vmatpush3.bf16.msra.mxu1 %v5614_v49 }
 0xe76   :  { %5122 = vmatprep.subr.bf16.mxu1 %v5386_v2 }
 0xee2   :  { %v2020_v23 = vpop.permute.xlu0 %2019 }
 0xf43   :  { %v1867_v17 = vpop.f32.mrb[20].mxu1 }
 0xf44   :  { %v1868_v19 = vadd.f32 %v5575_v35, %v1867_v17  ;;  %v4698_v20 = vpop.f32.mrb[21].mxu1 }
 0xf46   :  { %v1871_v21 = vmax.f32 %v1868_v19, 0.0 }
 0xf48   :  { %4708 = vmatmul.mubr.msk.f32.vlgmr.msra.gmra.mrb[22].mxu0 %vm169_vm2, %v1871_v21 }
 0xf49   :  { %5118 = vmatpush3.bf16.msra.mxu0 %v5584_v41  ;;  %4729 = vmatprep.mubr.msk.f32.mxu0 %vm5387_vm0, %v5388_v4 }
 0xf4a   :  { %5119 = vmatprep.subr.bf16.mxu0 %v5386_v2 }
 0xf4d   :  { %5121 = vmatpush3.bf16.msra.mxu0 %v5594_v45 }
 0xf4e   :  { %5125 = vmatprep.subr.bf16.mxu0 %v5386_v2 }
 0xf50   :  { %4730 = vmatmul.mubr.msk.f32.vlgmr.msra.gmra.mrb[24].mxu0 %vm169_vm2, %v2020_v23 }
 0xf51   :  { %5127 = vmatpush3.bf16.msra.mxu0 %v5501_v8  ;;  %4747 = vmatprep.mubr.msk.f32.mxu0 %vm5387_vm0, %v5388_v4 }
 0xf52   :  { %5128 = vmatprep.subr.bf16.mxu0 %v5386_v2 }
 0xf55   :  { %5130 = vmatpush3.bf16.msra.mxu0 %v5519_v11 }
 0xf56   :  { %5137 = vmatprep.subr.bf16.mxu0 %v5386_v2 }
0x101b   :  { %v1941_v24 = vpop.f32.mrb[22].mxu0 }
0x101c   :  { %v1942_v25 = vadd.f32 %v5621_v50, %v1941_v24  ;;  %v4709_v5 = vpop.f32.mrb[23].mxu0 }
0x101e   :  { %v1945_v28 = vmax.f32 %v1942_v25, 0.0 }
0x1020   :  { %4719 = vmatmul.mubr.msk.f32.vlgmr.msra.gmra.mrb[22].mxu1 %vm169_vm2, %v1945_v28 }
0x1021   :  { %5124 = vmatpush3.bf16.msra.mxu1 %v5483_v3  ;;  %4736 = vmatprep.mubr.msk.f32.mxu1 %vm5387_vm0, %v5388_v4 }
0x1022   :  { %5131 = vmatprep.subr.bf16.mxu1 %v5386_v2 }
0x1023   :  { %v2089_v29 = vpop.f32.mrb[24].mxu0 }
0x1024   :  { %v2090_v30 = vadd.f32 %v5628_v55, %v2089_v29  ;;  %v4731_v31 = vpop.f32.mrb[25].mxu0 }
0x1026   :  { %v2094_v32 = vmin.f32 %v2090_v30, 20.0  ;;  %vm2093_vm14 = vcmp.gt.f32.partialorder %v2090_v30, 20.0 }
0x1028   :  { %v2095_v34 = vmul.f32 1.442695, %v2094_v32 }
0x102a   :  { %5287 = vpow2.f32 %v2095_v34 }
0x1034   :  { %v5288_v36 = vpop.eup %5287 }
0x1035   :  { %v2097_v37 = vadd.f32 1.0, %v5288_v36  ;;  %v2100_v26 = vmul.f32 -0.5, %v5288_v36  ;;  %v2103_v39 = vand.u32 2147483647, %v5288_v36 }
0x1037   :  { %5289 = vlog2.f32 %v2097_v37  ;;  %v2101_v38 = vadd.f32 1.0, %v2100_v26  ;;  %vm2104_vm13 = vcmp.lt.f32.partialorder %v2103_v39, 0.0004427343 }
0x1039   :  { %v2102_v43 = vmul.f32 %v5288_v36, %v2101_v38 }
0x1041   :  { %v5290_v40 = vpop.eup %5289 }
0x1042   :  { %v2099_v42 = vmul.f32 0.6931472, %v5290_v40  ;;  %v2518_v40 = vpop.permute.xlu1 %2517 }
0x1044   :  { %v2105_v44 = vsel %vm2104_vm13, %v2102_v43, %v2099_v42 }
0x1045   :  { %v2106_v46 = vsel %vm2093_vm14, %v2090_v30, %v2105_v44 }
0x1046   :  { %v2107_v47 = vadd.f32 0.01, %v2106_v46 }
0x1048   :  { %2125 = vst.msk [vmem:[#allocation6 + $0x20] sm:$0xff] %vm58_vm1, %v2107_v47  ;;  %v2118_v56 = vmul.f32 %v2116_v54, %v2107_v47 }
0x10f3   :  { %v2015_v48 = vpop.f32.mrb[22].mxu1 }
0x10f4   :  { %v2016_v51 = vadd.f32 %v5639_v16, %v2015_v48  ;;  %v4720_v52 = vpop.f32.mrb[23].mxu1 }
0x10f6   :  { %v2111_v53 = vmul.f32 %v2016_v51, %v5641_v18  ;;  %2123 = vst.msk [vmem:[#allocation4 + $0x20] sm:$0xff] %vm58_vm1, %v2016_v51 }
0x10f8   :  { %v2112_v57 = vadd.f32 %v2111_v53, %v5827_v7 }
0x10fa   :  { %v5875_v58 = vadd.f32 %v2118_v56, %v2112_v57 }
0x10fc   :  { %2121 = vst.msk [vmem:[#allocation2 + $0x28] sm:$0xff] %vm58_vm1, %v5875_v58  ;;  %4737 = vmatmul.mubr.msk.f32.vlgmr.msra.gmra.mrb[24].mxu1 %vm58_vm1, %v5875_v58 }
0x10fd   :  { %5133 = vmatpush3.bf16.msra.mxu1 %v5529_v14  ;;  %4758 = vmatprep.mubr.msk.f32.mxu1 %vm5387_vm0, %v5388_v4 }
0x10fe   :  { %5134 = vmatprep.subr.bf16.mxu1 %v5386_v2 }
0x1101   :  { %5136 = vmatpush3.bf16.msra.mxu1 %v5549_v22 }
0x1102   :  { %5143 = vmatprep.subr.bf16.mxu1 %v5386_v2 }
0x11cf   :  { %v2195_v59 = vpop.f32.mrb[24].mxu1 }
0x11d0   :  { %v2196_v33 = vadd.f32 %v5536_v15, %v2195_v59  ;;  %v4738_v60 = vpop.f32.mrb[25].mxu1 }
0x11d2   :  { %v2199_v61 = vmax.f32 %v2196_v33, 0.0 }
0x11d4   :  { %2421 = vrot.lane.b32.xlu0 %v2199_v61, %s5389_s20  ;;  %4748 = vmatmul.mubr.msk.f32.vlgmr.msra.gmra.mrb[26].mxu0 %vm169_vm2, %v2199_v61 }
0x11d5   :  { %5139 = vmatpush3.bf16.msra.mxu0 %v5562_v27  ;;  %4769 = vmatprep.mubr.msk.f32.mxu0 %vm5387_vm0, %v5388_v4 }
0x11d6   :  { %5140 = vmatprep.subr.bf16.mxu0 %v5386_v2 }
0x11d9   :  { %5142 = vmatpush3.bf16.msra.mxu0 %v5614_v49 }
0x11da   :  { %5149 = vmatprep.subr.bf16.mxu0 %v5386_v2 }
0x1246   :  { %v2422_v6 = vpop.permute.xlu0 %2421 }
0x12a7   :  { %v2269_v62 = vpop.f32.mrb[26].mxu0 }
0x12a8   :  { %v2270_v63 = vadd.f32 %v5575_v35, %v2269_v62  ;;  %v4749_v0 = vpop.f32.mrb[27].mxu0 }
0x12aa   :  { %v2273_v1 = vmax.f32 %v2270_v63, 0.0 }
0x12ac   :  { %4759 = vmatmul.mubr.msk.f32.vlgmr.msra.gmra.mrb[26].mxu1 %vm169_vm2, %v2273_v1 }
0x12ad   :  { %5145 = vmatpush3.bf16.msra.mxu1 %v5584_v41  ;;  %4780 = vmatprep.mubr.msk.f32.mxu1 %vm5387_vm0, %v5388_v4 }
0x12ae   :  { %5146 = vmatprep.subr.bf16.mxu1 %v5386_v2 }
0x12b1   :  { %5148 = vmatpush3.bf16.msra.mxu1 %v5594_v45 }
0x12b2   :  { %5152 = vmatprep.subr.bf16.mxu1 %v5386_v2 }
0x12b4   :  { %4781 = vmatmul.mubr.msk.f32.vlgmr.msra.gmra.mrb[28].mxu1 %vm169_vm2, %v2422_v6 }
0x12b5   :  { %5154 = vmatpush3.bf16.msra.mxu1 %v5501_v8  ;;  %4798 = vmatprep.mubr.msk.f32.mxu1 %vm5387_vm0, %v5388_v4 }
0x12b6   :  { %5155 = vmatprep.subr.bf16.mxu1 %v5386_v2 }
0x12b9   :  { %5157 = vmatpush3.bf16.msra.mxu1 %v5519_v11 }
0x12ba   :  { %5164 = vmatprep.subr.bf16.mxu1 %v5386_v2 }
0x137f   :  { %v2343_v7 = vpop.f32.mrb[26].mxu1 }
0x1380   :  { %v2344_v9 = vadd.f32 %v5621_v50, %v2343_v7  ;;  %v4760_v10 = vpop.f32.mrb[27].mxu1 }
0x1382   :  { %v2347_v12 = vmax.f32 %v2344_v9, 0.0 }
0x1384   :  { %4770 = vmatmul.mubr.msk.f32.vlgmr.msra.gmra.mrb[28].mxu0 %vm169_vm2, %v2347_v12 }
0x1385   :  { %5151 = vmatpush3.bf16.msra.mxu0 %v5483_v3  ;;  %4787 = vmatprep.mubr.msk.f32.mxu0 %vm5387_vm0, %v5388_v4 }
0x1386   :  { %5158 = vmatprep.subr.bf16.mxu0 %v5386_v2 }
0x1387   :  { %v2491_v13 = vpop.f32.mrb[28].mxu1 }
0x1388   :  { %v2492_v17 = vadd.f32 %v5628_v55, %v2491_v13  ;;  %v4782_v19 = vpop.f32.mrb[29].mxu1 }
0x138a   :  { %v2496_v20 = vmin.f32 %v2492_v17, 20.0  ;;  %vm2495_vm3 = vcmp.gt.f32.partialorder %v2492_v17, 20.0 }
0x138c   :  { %v2497_v21 = vmul.f32 1.442695, %v2496_v20 }
0x138e   :  { %5291 = vpow2.f32 %v2497_v21 }
0x1398   :  { %v5292_v23 = vpop.eup %5291 }
0x1399   :  { %v2499_v24 = vadd.f32 1.0, %v5292_v23  ;;  %v2502_v25 = vmul.f32 -0.5, %v5292_v23  ;;  %v2505_v28 = vand.u32 2147483647, %v5292_v23 }
0x139b   :  { %5293 = vlog2.f32 %v2499_v24  ;;  %v2503_v5 = vadd.f32 1.0, %v2502_v25  ;;  %vm2506_vm15 = vcmp.lt.f32.partialorder %v2505_v28, 0.0004427343  ;;  %v2920_v24 = vpop.permute.xlu1 %2919 }
0x139d   :  { %v2504_v31 = vmul.f32 %v5292_v23, %v2503_v5 }
0x13a5   :  { %v5294_v29 = vpop.eup %5293 }
0x13a6   :  { %v2501_v30 = vmul.f32 0.6931472, %v5294_v29  ;;  %v5986_v29 = vld [vmem:[%s6188_s4] ss:$0 sm:$0xff] }
0x13a8   :  { %v2507_v32 = vsel %vm2506_vm15, %v2504_v31, %v2501_v30 }
0x13a9   :  { %v2508_v34 = vsel %vm2495_vm3, %v2492_v17, %v2507_v32 }
0x13aa   :  { %v2509_v36 = vadd.f32 0.01, %v2508_v34 }
0x13ac   :  { %2527 = vst.msk [vmem:[#allocation6 + $0x28] sm:$0xff] %vm58_vm1, %v2509_v36  ;;  %v2520_v42 = vmul.f32 %v2518_v40, %v2509_v36  ;;  %v6000_v36 = vld [vmem:[%s6190_s6] ss:$0 sm:$0xff] }
0x1457   :  { %v2417_v37 = vpop.f32.mrb[28].mxu0 }
0x1458   :  { %v2418_v26 = vadd.f32 %v5639_v16, %v2417_v37  ;;  %v4771_v38 = vpop.f32.mrb[29].mxu0 }
0x145a   :  { %v2513_v39 = vmul.f32 %v2418_v26, %v5641_v18  ;;  %2525 = vst.msk [vmem:[#allocation4 + $0x28] sm:$0xff] %vm58_vm1, %v2418_v26 }
0x145c   :  { %v2514_v43 = vadd.f32 %v2513_v39, %v5875_v58 }
0x145e   :  { %v5923_v44 = vadd.f32 %v2520_v42, %v2514_v43  ;;  %v6020_v42 = vld [vmem:[%s6192_s8] ss:$0 sm:$0xff] }
0x1460   :  { %2523 = vst.msk [vmem:[#allocation2 + $0x30] sm:$0xff] %vm58_vm1, %v5923_v44  ;;  %4788 = vmatmul.mubr.msk.f32.vlgmr.msra.gmra.mrb[30].mxu0 %vm58_vm1, %v5923_v44 }
0x1461   :  { %5160 = vmatpush3.bf16.msra.mxu0 %v5529_v14  ;;  %4809 = vmatprep.mubr.msk.f32.mxu0 %vm5387_vm0, %v5388_v4 }
0x1462   :  { %5161 = vmatprep.subr.bf16.mxu0 %v5386_v2 }
0x1465   :  { %5163 = vmatpush3.bf16.msra.mxu0 %v5549_v22 }
0x1466   :  { %5170 = vmatprep.subr.bf16.mxu0 %v5386_v2 }
0x1533   :  { %v2597_v46 = vpop.f32.mrb[30].mxu0 }
0x1534   :  { %v2598_v47 = vadd.f32 %v5536_v15, %v2597_v46  ;;  %v4789_v48 = vpop.f32.mrb[31].mxu0 }
0x1535   :  { %v6031_v48 = vld [vmem:[%s6196_s12] ss:$0 sm:$0xff] }
0x1536   :  { %v2601_v51 = vmax.f32 %v2598_v47, 0.0 }
0x1538   :  { %2823 = vrot.lane.b32.xlu0 %v2601_v51, %s5389_s20  ;;  %4799 = vmatmul.mubr.msk.f32.vlgmr.msra.gmra.mrb[30].mxu1 %vm169_vm2, %v2601_v51 }
0x1539   :  { %5166 = vmatpush3.bf16.msra.mxu1 %v5562_v27  ;;  %4820 = vmatprep.mubr.msk.f32.mxu1 %vm5387_vm0, %v5388_v4 }
0x153a   :  { %5167 = vmatprep.subr.bf16.mxu1 %v5386_v2 }
0x153d   :  { %5169 = vmatpush3.bf16.msra.mxu1 %v5614_v49 }
0x153e   :  { %5176 = vmatprep.subr.bf16.mxu1 %v5386_v2 }
0x15aa   :  { %v2824_v56 = vpop.permute.xlu0 %2823 }
0x160b   :  { %v2671_v52 = vpop.f32.mrb[30].mxu1 }
0x160c   :  { %v2672_v15 = vadd.f32 %v5575_v35, %v2671_v52  ;;  %v4800_v53 = vpop.f32.mrb[31].mxu1 }
0x160e   :  { %v2675_v54 = vmax.f32 %v2672_v15, 0.0 }
0x1610   :  { %4810 = vmatmul.mubr.msk.f32.vlgmr.msra.gmra.mrb[32].mxu0 %vm169_vm2, %v2675_v54 }
0x1611   :  { %5172 = vmatpush3.bf16.msra.mxu0 %v5584_v41  ;;  %4831 = vmatprep.mubr.msk.f32.mxu0 %vm5387_vm0, %v5388_v4 }
0x1612   :  { %5173 = vmatprep.subr.bf16.mxu0 %v5386_v2 }
0x1615   :  { %5175 = vmatpush3.bf16.msra.mxu0 %v5594_v45 }
0x1616   :  { %5179 = vmatprep.subr.bf16.mxu0 %v5386_v2 }
0x1618   :  { %4832 = vmatmul.mubr.msk.f32.vlgmr.msra.gmra.mrb[34].mxu0 %vm169_vm2, %v2824_v56 }
0x1619   :  { %5181 = vmatpush3.bf16.msra.mxu0 %v5501_v8  ;;  %4849 = vmatprep.mubr.msk.f32.mxu0 %vm5387_vm0, %v5388_v4 }
0x161a   :  { %5182 = vmatprep.subr.bf16.mxu0 %v5386_v2 }
0x161d   :  { %5184 = vmatpush3.bf16.msra.mxu0 %v5519_v11 }
0x161e   :  { %5191 = vmatprep.subr.bf16.mxu0 %v5386_v2 }
0x16e3   :  { %v2745_v35 = vpop.f32.mrb[32].mxu0 }
0x16e4   :  { %v2746_v57 = vadd.f32 %v5621_v50, %v2745_v35  ;;  %v4811_v58 = vpop.f32.mrb[33].mxu0 }
0x16e6   :  { %v2749_v59 = vmax.f32 %v2746_v57, 0.0 }
0x16e8   :  { %4821 = vmatmul.mubr.msk.f32.vlgmr.msra.gmra.mrb[32].mxu1 %vm169_vm2, %v2749_v59 }
0x16e9   :  { %5178 = vmatpush3.bf16.msra.mxu1 %v5483_v3  ;;  %4838 = vmatprep.mubr.msk.f32.mxu1 %vm5387_vm0, %v5388_v4 }
0x16ea   :  { %5185 = vmatprep.subr.bf16.mxu1 %v5386_v2 }
0x16eb   :  { %v2893_v33 = vpop.f32.mrb[34].mxu0 }
0x16ec   :  { %v2894_v60 = vadd.f32 %v5628_v55, %v2893_v33  ;;  %v4833_v61 = vpop.f32.mrb[35].mxu0 }
0x16ee   :  { %v2898_v62 = vmin.f32 %v2894_v60, 20.0  ;;  %vm2897_vm5 = vcmp.gt.f32.partialorder %v2894_v60, 20.0 }
0x16f0   :  { %v2899_v63 = vmul.f32 1.442695, %v2898_v62 }
0x16f2   :  { %5295 = vpow2.f32 %v2899_v63 }
0x16fc   :  { %v5296_v0 = vpop.eup %5295 }
0x16fd   :  { %v2901_v50 = vadd.f32 1.0, %v5296_v0  ;;  %v2904_v1 = vmul.f32 -0.5, %v5296_v0  ;;  %v2907_v7 = vand.u32 2147483647, %v5296_v0 }
0x16ff   :  { %5297 = vlog2.f32 %v2901_v50  ;;  %v2905_v6 = vadd.f32 1.0, %v2904_v1  ;;  %vm2908_vm4 = vcmp.lt.f32.partialorder %v2907_v7, 0.0004427343  ;;  %v6038_v50 = vld [vmem:[%s6194_s10] ss:$0 sm:$0xff]  ;;  %s5391_s10 = smov [#allocation4]  }
0x1701   :  { %v2906_v12 = vmul.f32 %v5296_v0, %v2905_v6 }
0x1709   :  { %v5298_v9 = vpop.eup %5297 }
0x170a   :  { %v2903_v10 = vmul.f32 0.6931472, %v5298_v9  ;;  %v3322_v9 = vpop.permute.xlu1 %3321 }
0x170c   :  { %v2909_v13 = vsel %vm2908_vm4, %v2906_v12, %v2903_v10 }
0x170d   :  { %v2910_v17 = vsel %vm2897_vm5, %v2894_v60, %v2909_v13 }
0x170e   :  { %v2911_v19 = vadd.f32 0.01, %v2910_v17 }
0x1710   :  { %2929 = vst.msk [vmem:[#allocation6 + $0x30] sm:$0xff] %vm58_vm1, %v2911_v19  ;;  %v2922_v25 = vmul.f32 %v2920_v24, %v2911_v19 }
0x17bb   :  { %v2819_v55 = vpop.f32.mrb[32].mxu1 }
0x17bc   :  { %v2820_v20 = vadd.f32 %v5639_v16, %v2819_v55  ;;  %v4822_v21 = vpop.f32.mrb[33].mxu1 }
0x17be   :  { %v2915_v23 = vmul.f32 %v2820_v20, %v5641_v18  ;;  %2927 = vst.msk [vmem:[#allocation4 + $0x30] sm:$0xff] %vm58_vm1, %v2820_v20 }
0x17c0   :  { %v2916_v5 = vadd.f32 %v2915_v23, %v5923_v44 }
0x17c2   :  { %v5971_v28 = vadd.f32 %v2922_v25, %v2916_v5 }
0x17c4   :  { %2925 = vst.msk [vmem:[#allocation2 + $0x38] sm:$0xff] %vm58_vm1, %v5971_v28  ;;  %4839 = vmatmul.mubr.msk.f32.vlgmr.msra.gmra.mrb[34].mxu1 %vm58_vm1, %v5971_v28 }
0x17c5   :  { %5187 = vmatpush3.bf16.msra.mxu1 %v5529_v14  ;;  %4860 = vmatprep.mubr.msk.f32.mxu1 %vm5387_vm0, %v5388_v4 }
0x17c6   :  { %5188 = vmatprep.subr.bf16.mxu1 %v5386_v2 }
0x17c9   :  { %5190 = vmatpush3.bf16.msra.mxu1 %v5549_v22 }
0x17ca   :  { %5197 = vmatprep.subr.bf16.mxu1 %v5386_v2 }
0x1897   :  { %v2999_v16 = vpop.f32.mrb[34].mxu1 }
0x1898   :  { %v3000_v30 = vadd.f32 %v5986_v29, %v2999_v16  ;;  %v4840_v31 = vpop.f32.mrb[35].mxu1 }
0x189a   :  { %v3003_v32 = vmax.f32 %v3000_v30, 0.0 }
0x189c   :  { %3225 = vrot.lane.b32.xlu0 %v3003_v32, %s5389_s20  ;;  %4850 = vmatmul.mubr.msk.f32.vlgmr.msra.gmra.mrb[36].mxu0 %vm169_vm2, %v3003_v32 }
0x189d   :  { %5193 = vmatpush3.bf16.msra.mxu0 %v5562_v27  ;;  %4871 = vmatprep.mubr.msk.f32.mxu0 %vm5387_vm0, %v5388_v4 }
0x189e   :  { %5194 = vmatprep.subr.bf16.mxu0 %v5386_v2 }
0x18a1   :  { %5196 = vmatpush3.bf16.msra.mxu0 %v5614_v49 }
0x18a2   :  { %5203 = vmatprep.subr.bf16.mxu0 %v5386_v2 }
0x190e   :  { %v3226_v39 = vpop.permute.xlu0 %3225 }
0x196f   :  { %v3073_v34 = vpop.f32.mrb[36].mxu0 }
0x1970   :  { %v3074_v37 = vadd.f32 %v6000_v36, %v3073_v34  ;;  %v4851_v26 = vpop.f32.mrb[37].mxu0 }
0x1972   :  { %v3077_v38 = vmax.f32 %v3074_v37, 0.0 }
0x1974   :  { %4861 = vmatmul.mubr.msk.f32.vlgmr.msra.gmra.mrb[36].mxu1 %vm169_vm2, %v3077_v38 }
0x1975   :  { %5199 = vmatpush3.bf16.msra.mxu1 %v5584_v41  ;;  %4882 = vmatprep.mubr.msk.f32.mxu1 %vm5387_vm0, %v5388_v4 }
0x1976   :  { %5200 = vmatprep.subr.bf16.mxu1 %v5386_v2 }
0x1979   :  { %5202 = vmatpush3.bf16.msra.mxu1 %v5594_v45 }
0x197a   :  { %5206 = vmatprep.subr.bf16.mxu1 %v5386_v2 }
0x197c   :  { %4883 = vmatmul.mubr.msk.f32.vlgmr.msra.gmra.mrb[38].mxu1 %vm169_vm2, %v3226_v39 }
0x197d   :  { %5208 = vmatpush3.bf16.msra.mxu1 %v5501_v8  ;;  %4900 = vmatprep.mubr.msk.f32.mxu1 %vm5387_vm0, %v5388_v4 }
0x197e   :  { %5209 = vmatprep.subr.bf16.mxu1 %v5386_v2 }
0x1981   :  { %5211 = vmatpush3.bf16.msra.mxu1 %v5519_v11 }
0x1982   :  { %5218 = vmatprep.subr.bf16.mxu1 %v5386_v2 }
0x1a47   :  { %v3147_v40 = vpop.f32.mrb[36].mxu1 }
0x1a48   :  { %v3148_v43 = vadd.f32 %v6020_v42, %v3147_v40  ;;  %v4862_v44 = vpop.f32.mrb[37].mxu1 }
0x1a4a   :  { %v3151_v46 = vmax.f32 %v3148_v43, 0.0 }
0x1a4c   :  { %4872 = vmatmul.mubr.msk.f32.vlgmr.msra.gmra.mrb[38].mxu0 %vm169_vm2, %v3151_v46 }
0x1a4d   :  { %5205 = vmatpush3.bf16.msra.mxu0 %v5483_v3  ;;  %4889 = vmatprep.mubr.msk.f32.mxu0 %vm5387_vm0, %v5388_v4 }
0x1a4e   :  { %5212 = vmatprep.subr.bf16.mxu0 %v5386_v2 }
0x1a4f   :  { %v3295_v47 = vpop.f32.mrb[38].mxu1 }
0x1a50   :  { %v3296_v51 = vadd.f32 %v6031_v48, %v3295_v47  ;;  %v4884_v52 = vpop.f32.mrb[39].mxu1 }
0x1a52   :  { %v3300_v15 = vmin.f32 %v3296_v51, 20.0  ;;  %vm3299_vm7 = vcmp.gt.f32.partialorder %v3296_v51, 20.0 }
0x1a54   :  { %v3301_v53 = vmul.f32 1.442695, %v3300_v15 }
0x1a56   :  { %5299 = vpow2.f32 %v3301_v53 }
0x1a60   :  { %v5300_v54 = vpop.eup %5299 }
0x1a61   :  { %v3303_v56 = vadd.f32 1.0, %v5300_v54  ;;  %v3306_v35 = vmul.f32 -0.5, %v5300_v54  ;;  %v3309_v58 = vand.u32 2147483647, %v5300_v54 }
0x1a63   :  { %5301 = vlog2.f32 %v3303_v56  ;;  %v3307_v57 = vadd.f32 1.0, %v3306_v35  ;;  %vm3310_vm6 = vcmp.lt.f32.partialorder %v3309_v58, 0.0004427343  ;;  %v3724_v35 = vpop.permute.xlu1 %3723 }
0x1a65   :  { %v3308_v60 = vmul.f32 %v5300_v54, %v3307_v57 }
0x1a6d   :  { %v5302_v59 = vpop.eup %5301 }
0x1a6e   :  { %v3305_v33 = vmul.f32 0.6931472, %v5302_v59 }
0x1a70   :  { %v3311_v61 = vsel %vm3310_vm6, %v3308_v60, %v3305_v33 }
0x1a71   :  { %v3312_v62 = vsel %vm3299_vm7, %v3296_v51, %v3311_v61 }
0x1a72   :  { %v3313_v63 = vadd.f32 0.01, %v3312_v62 }
0x1a74   :  { %3331 = vst.msk [vmem:[#allocation6 + $0x38] sm:$0xff] %vm58_vm1, %v3313_v63  ;;  %v3324_v10 = vmul.f32 %v3322_v9, %v3313_v63 }
0x1b1f   :  { %v3221_v0 = vpop.f32.mrb[38].mxu0 }
0x1b20   :  { %v3222_v1 = vadd.f32 %v6038_v50, %v3221_v0  ;;  %v4873_v6 = vpop.f32.mrb[39].mxu0 }
0x1b22   :  { %v3317_v7 = vmul.f32 %v3222_v1, %v5641_v18  ;;  %3329 = vst.msk [vmem:[#allocation4 + $0x38] sm:$0xff] %vm58_vm1, %v3222_v1 }
0x1b24   :  { %v3318_v12 = vadd.f32 %v3317_v7, %v5971_v28 }
0x1b26   :  { %v6044_v13 = vadd.f32 %v3324_v10, %v3318_v12 }
0x1b28   :  { %3327 = vst.msk [vmem:[#allocation2 + $0x40] sm:$0xff] %vm58_vm1, %v6044_v13  ;;  %4890 = vmatmul.mubr.msk.f32.vlgmr.msra.gmra.mrb[40].mxu0 %vm58_vm1, %v6044_v13 }
0x1b29   :  { %5214 = vmatpush3.bf16.msra.mxu0 %v5529_v14  ;;  %4911 = vmatprep.mubr.msk.f32.mxu0 %vm5387_vm0, %v5388_v4 }
0x1b2a   :  { %5215 = vmatprep.subr.bf16.mxu0 %v5386_v2 }
0x1b2d   :  { %5217 = vmatpush3.bf16.msra.mxu0 %v5549_v22 }
0x1b2e   :  { %5224 = vmatprep.subr.bf16.mxu0 %v5386_v2 }
0x1bfb   :  { %v3401_v17 = vpop.f32.mrb[40].mxu0 }
0x1bfc   :  { %v3402_v19 = vadd.f32 %v5986_v29, %v3401_v17  ;;  %v4891_v55 = vpop.f32.mrb[41].mxu0 }
0x1bfe   :  { %v3405_v20 = vmax.f32 %v3402_v19, 0.0 }
0x1c00   :  { %3627 = vrot.lane.b32.xlu0 %v3405_v20, %s5389_s20  ;;  %4901 = vmatmul.mubr.msk.f32.vlgmr.msra.gmra.mrb[40].mxu1 %vm169_vm2, %v3405_v20 }
0x1c01   :  { %5220 = vmatpush3.bf16.msra.mxu1 %v5562_v27  ;;  %4922 = vmatprep.mubr.msk.f32.mxu1 %vm5387_vm0, %v5388_v4 }
0x1c02   :  { %5221 = vmatprep.subr.bf16.mxu1 %v5386_v2 }
0x1c05   :  { %5223 = vmatpush3.bf16.msra.mxu1 %v5614_v49 }
0x1c06   :  { %5230 = vmatprep.subr.bf16.mxu1 %v5386_v2 }
0x1c72   :  { %v3628_v5 = vpop.permute.xlu0 %3627 }
0x1cd3   :  { %v3475_v21 = vpop.f32.mrb[40].mxu1 }
0x1cd4   :  { %v3476_v23 = vadd.f32 %v6000_v36, %v3475_v21  ;;  %v4902_v24 = vpop.f32.mrb[41].mxu1 }
0x1cd6   :  { %v3479_v25 = vmax.f32 %v3476_v23, 0.0 }
0x1cd8   :  { %4912 = vmatmul.mubr.msk.f32.vlgmr.msra.gmra.mrb[42].mxu0 %vm169_vm2, %v3479_v25 }
0x1cd9   :  { %5226 = vmatpush3.bf16.msra.mxu0 %v5584_v41  ;;  %4933 = vmatprep.mubr.msk.f32.mxu0 %vm5387_vm0, %v5388_v4 }
0x1cda   :  { %5227 = vmatprep.subr.bf16.mxu0 %v5386_v2 }
0x1cdd   :  { %5229 = vmatpush3.bf16.msra.mxu0 %v5594_v45 }
0x1cde   :  { %5233 = vmatprep.subr.bf16.mxu0 %v5386_v2 }
0x1ce0   :  { %4934 = vmatmul.mubr.msk.f32.vlgmr.msra.gmra.mrb[44].mxu0 %vm169_vm2, %v3628_v5  ;;  %v4126_v5 = vpop.permute.xlu1 %4125 }
0x1ce1   :  { %5235 = vmatpush3.bf16.msra.mxu0 %v5501_v8  ;;  %4951 = vmatprep.mubr.msk.f32.mxu0 %vm5387_vm0, %v5388_v4 }
0x1ce2   :  { %5236 = vmatprep.subr.bf16.mxu0 %v5386_v2 }
0x1ce5   :  { %5238 = vmatpush3.bf16.msra.mxu0 %v5519_v11 }
0x1ce6   :  { %5245 = vmatprep.subr.bf16.mxu0 %v5386_v2 }
0x1dab   :  { %v3549_v28 = vpop.f32.mrb[42].mxu0 }
0x1dac   :  { %v3550_v16 = vadd.f32 %v6020_v42, %v3549_v28  ;;  %v4913_v30 = vpop.f32.mrb[43].mxu0 }
0x1dae   :  { %v3553_v31 = vmax.f32 %v3550_v16, 0.0 }
0x1db0   :  { %4923 = vmatmul.mubr.msk.f32.vlgmr.msra.gmra.mrb[42].mxu1 %vm169_vm2, %v3553_v31 }
0x1db1   :  { %5232 = vmatpush3.bf16.msra.mxu1 %v5483_v3  ;;  %4940 = vmatprep.mubr.msk.f32.mxu1 %vm5387_vm0, %v5388_v4 }
0x1db2   :  { %5239 = vmatprep.subr.bf16.mxu1 %v5386_v2 }
0x1db3   :  { %v3697_v8 = vpop.f32.mrb[44].mxu0 }
0x1db4   :  { %v3698_v32 = vadd.f32 %v6031_v48, %v3697_v8  ;;  %v4935_v11 = vpop.f32.mrb[45].mxu0 }
0x1db6   :  { %v3702_v34 = vmin.f32 %v3698_v32, 20.0  ;;  %vm3701_vm9 = vcmp.gt.f32.partialorder %v3698_v32, 20.0 }
0x1db8   :  { %v3703_v37 = vmul.f32 1.442695, %v3702_v34 }
0x1dba   :  { %5303 = vpow2.f32 %v3703_v37 }
0x1dc4   :  { %v5304_v26 = vpop.eup %5303 }
0x1dc5   :  { %v3705_v38 = vadd.f32 1.0, %v5304_v26  ;;  %v3708_v39 = vmul.f32 -0.5, %v5304_v26  ;;  %v3711_v43 = vand.u32 2147483647, %v5304_v26 }
0x1dc7   :  { %5305 = vlog2.f32 %v3705_v38  ;;  %v3709_v40 = vadd.f32 1.0, %v3708_v39  ;;  %vm3712_vm8 = vcmp.lt.f32.partialorder %v3711_v43, 0.0004427343 }
0x1dc9   :  { %v3710_v46 = vmul.f32 %v5304_v26, %v3709_v40 }
0x1dd1   :  { %v5306_v44 = vpop.eup %5305 }
0x1dd2   :  { %v3707_v3 = vmul.f32 0.6931472, %v5306_v44 }
0x1dd4   :  { %v3713_v47 = vsel %vm3712_vm8, %v3710_v46, %v3707_v3 }
0x1dd5   :  { %v3714_v51 = vsel %vm3701_vm9, %v3698_v32, %v3713_v47 }
0x1dd6   :  { %v3715_v52 = vadd.f32 0.01, %v3714_v51 }
0x1dd8   :  { %3733 = vst.msk [vmem:[#allocation6 + $0x40] sm:$0xff] %vm58_vm1, %v3715_v52  ;;  %v3726_v57 = vmul.f32 %v3724_v35, %v3715_v52 }
0x1e83   :  { %v3623_v15 = vpop.f32.mrb[42].mxu1 }
0x1e84   :  { %v3624_v53 = vadd.f32 %v6038_v50, %v3623_v15  ;;  %v4924_v54 = vpop.f32.mrb[43].mxu1 }
0x1e86   :  { %v3719_v56 = vmul.f32 %v3624_v53, %v5641_v18  ;;  %3731 = vst.msk [vmem:[#allocation4 + $0x40] sm:$0xff] %vm58_vm1, %v3624_v53 }
0x1e88   :  { %v3720_v58 = vadd.f32 %v3719_v56, %v6044_v13 }
0x1e8a   :  { %v6092_v59 = vadd.f32 %v3726_v57, %v3720_v58 }
0x1e8c   :  { %3729 = vst.msk [vmem:[#allocation2 + $0x48] sm:$0xff] %vm58_vm1, %v6092_v59  ;;  %4941 = vmatmul.mubr.msk.f32.vlgmr.msra.gmra.mrb[44].mxu1 %vm58_vm1, %v6092_v59 }
0x1e8d   :  { %5241 = vmatpush3.bf16.msra.mxu1 %v5529_v14  ;;  %4962 = vmatprep.mubr.msk.f32.mxu1 %vm5387_vm0, %v5388_v4 }
0x1e8e   :  { %5242 = vmatprep.subr.bf16.mxu1 %v5386_v2 }
0x1e91   :  { %5244 = vmatpush3.bf16.msra.mxu1 %v5549_v22 }
0x1e92   :  { %5251 = vmatprep.subr.bf16.mxu1 %v5386_v2 }
0x1f5f   :  { %v3803_v33 = vpop.f32.mrb[44].mxu1 }
0x1f60   :  { %v3804_v60 = vadd.f32 %v5986_v29, %v3803_v33  ;;  %v4942_v61 = vpop.f32.mrb[45].mxu1 }
0x1f62   :  { %v3807_v62 = vmax.f32 %v3804_v60, 0.0 }
0x1f64   :  { %4029 = vrot.lane.b32.xlu0 %v3807_v62, %s5389_s20  ;;  %4952 = vmatmul.mubr.msk.f32.vlgmr.msra.gmra.mrb[46].mxu0 %vm169_vm2, %v3807_v62  ;;  %s4153_s20 = sshll.u32 %s5391_s10, 4  ;;  %s4154_s20 = int_to_ptr.vmem [resolvable:$true] %s4153_s20 }
0x1f65   :  { %5247 = vmatpush3.bf16.msra.mxu0 %v5562_v27  ;;  %4973 = vmatprep.mubr.msk.f32.mxu0 %vm5387_vm0, %v5388_v4  ;;  %s5316_s5 = scalar_lea.vmem %s4154_s20, 1280  ;;  %p5321_p1 = scmp.lt.s32.totalorder %s4154_s20, %s4154_s20 }
0x1f66   :  { %5248 = vmatprep.subr.bf16.mxu0 %v5386_v2  ;;  %p5317_p0 = scmp.ne.s32.totalorder %s4154_s20, %s5316_s5  ;;  %p5322_p2 = scmp.lt.s32.totalorder %s5316_s5, %s5316_s5 }
0x1f68   :  { %p5323_p3 = por %p5322_p2, %p5321_p1 }
0x1f69   :  { %5250 = vmatpush3.bf16.msra.mxu0 %v5614_v49 }
0x1f6a   :  { %p5324_p4 = pnand %p5323_p3, %p5317_p0 }
0x1fd6   :  { %v4030_v27 = vpop.permute.xlu0 %4029 }
0x2037   :  { %v3877_v14 = vpop.f32.mrb[46].mxu0 }
0x2038   :  { %v3878_v22 = vadd.f32 %v6000_v36, %v3877_v14  ;;  %v4953_v63 = vpop.f32.mrb[47].mxu0 }
0x203a   :  { %v3881_v29 = vmax.f32 %v3878_v22, 0.0 }
0x203c   :  { %4963 = vmatmul.mubr.msk.f32.vlgmr.msra.gmra.mrb[46].mxu1 %vm169_vm2, %v3881_v29 }
0x203d   :  { %5253 = vmatpush3.bf16.msra.mxu1 %v5584_v41  ;;  %4984 = vmatprep.mubr.msk.f32.mxu1 %vm5387_vm0, %v5388_v4 }
0x203e   :  { %5254 = vmatprep.subr.bf16.mxu1 %v5386_v2 }
0x2041   :  { %5256 = vmatpush3.bf16.msra.mxu1 %v5594_v45 }
0x2044   :  { %4985 = vmatmul.mubr.msk.f32.vlgmr.msra.gmra.mrb[48].mxu1 %vm169_vm2, %v4030_v27 }
0x210f   :  { %v3951_v49 = vpop.f32.mrb[46].mxu1 }
0x2110   :  { %v3952_v0 = vadd.f32 %v6020_v42, %v3951_v49  ;;  %v4964_v36 = vpop.f32.mrb[47].mxu1 }
0x2112   :  { %v3955_v1 = vmax.f32 %v3952_v0, 0.0 }
0x2114   :  { %4974 = vmatmul.mubr.msk.f32.vlgmr.msra.gmra.mrb[48].mxu0 %vm169_vm2, %v3955_v1 }
0x2117   :  { %v4099_v6 = vpop.f32.mrb[48].mxu1 }
0x2118   :  { %v4100_v41 = vadd.f32 %v6031_v48, %v4099_v6  ;;  %v4986_v7 = vpop.f32.mrb[49].mxu1 }
0x211a   :  { %v4104_v9 = vmin.f32 %v4100_v41, 20.0  ;;  %vm4103_vm10 = vcmp.gt.f32.partialorder %v4100_v41, 20.0 }
0x211c   :  { %v4105_v4 = vmul.f32 1.442695, %v4104_v9 }
0x211e   :  { %5307 = vpow2.f32 %v4105_v4 }
0x2128   :  { %v5308_v2 = vpop.eup %5307 }
0x2129   :  { %v4107_v10 = vadd.f32 1.0, %v5308_v2  ;;  %v4110_v45 = vmul.f32 -0.5, %v5308_v2  ;;  %v4113_v13 = vand.u32 2147483647, %v5308_v2 }
0x212b   :  { %5309 = vlog2.f32 %v4107_v10  ;;  %v4111_v12 = vadd.f32 1.0, %v4110_v45  ;;  %vm4114_vm0 = vcmp.lt.f32.partialorder %v4113_v13, 0.0004427343 }
0x212d   :  { %v4112_v42 = vmul.f32 %v5308_v2, %v4111_v12 }
0x2135   :  { %v5310_v17 = vpop.eup %5309 }
0x2136   :  { %v4109_v19 = vmul.f32 0.6931472, %v5310_v17 }
0x2138   :  { %v4115_v55 = vsel %vm4114_vm0, %v4112_v42, %v4109_v19 }
0x2139   :  { %v4116_v20 = vsel %vm4103_vm10, %v4100_v41, %v4115_v55 }
0x213a   :  { %v4117_v21 = vadd.f32 0.01, %v4116_v20 }
0x213c   :  { %4135 = vst.msk [vmem:[#allocation6 + $0x48] sm:$0xff] %vm58_vm1, %v4117_v21 }
0x21e7   :  { %v4025_v48 = vpop.f32.mrb[48].mxu0 }
0x21e8   :  { %v4026_v23 = vadd.f32 %v6038_v50, %v4025_v48  ;;  %v4975_v24 = vpop.f32.mrb[49].mxu0 }
0x21ea   :  { %v4121_v25 = vmul.f32 %v4026_v23, %v5641_v18  ;;  %4133 = vst.msk [vmem:[#allocation4 + $0x48] sm:$0xff] %vm58_vm1, %v4026_v23 }
0x21eb   :  { %5327 = shalt.err (!%p5324_p4)
}
0x21ec   :  { %s5328_s22 = scalar_lea.hbm %s6198_s14, 1280 }
0x21ed   :  { %p5329_p5 = scmp.ne.s32.totalorder %s6198_s14, %s5328_s22  ;;  %p5332_p6 = scmp.lt.u32.totalorder %s5328_s22, %s6198_s14 }
0x21ef   :  { %p5334_p7 = pnand %p5332_p6, %p5329_p5 }
0x21f1   :  { %5337 = shalt.err (!%p5334_p7)
}
0x21f2   :  { %s5394_s3 = smov 128   ;;  %s5395_s26 = smov 8   ;;  %v4128_v18 = vmul.f32 %v4126_v5, %v4117_v21  ;;  %v4122_v50 = vadd.f32 %v4121_v25, %v6092_v59 }
0x21f3   :  { %4159 = dma.vmem_to_hbm [thread:$0]  %s4154_s20, 1280, %s6198_s14, [#allocation5], %s5394_s3, %s5394_s3, %s5395_s26  }
0x21f4   :  { %s5338_s2 = scalar_lea.vmem %s6125_s16, 1280  ;;  %p5343_p9 = scmp.lt.s32.totalorder %s6125_s16, %s6125_s16 }
0x21f5   :  { %p5339_p8 = scmp.ne.s32.totalorder %s6125_s16, %s5338_s2  ;;  %p5344_p10 = scmp.lt.s32.totalorder %s5338_s2, %s5338_s2 }
0x21f7   :  { %p5345_p11 = por %p5344_p10, %p5343_p9 }
0x21f9   :  { %p5346_p12 = pnand %p5345_p11, %p5339_p8 }
0x21fb   :  { %5349 = shalt.err (!%p5346_p12)
}
0x21fc   :  { %s5350_s28 = scalar_lea.hbm %s6199_s15, 1280 }
0x21fd   :  { %p5351_p13 = scmp.ne.s32.totalorder %s6199_s15, %s5350_s28  ;;  %p5354_p0 = scmp.lt.u32.totalorder %s5350_s28, %s6199_s15 }
0x21ff   :  { %p5356_p1 = pnand %p5354_p0, %p5351_p13 }
0x2201   :  { %5359 = shalt.err (!%p5356_p1)
}
0x2202   :  { %4171 = dma.vmem_to_hbm [thread:$0]  %s6125_s16, 1280, %s6199_s15, [#allocation5], %s5394_s3, %s5394_s3, %s5395_s26   ;;  %v4129_v28 = vadd.f32 %v4128_v18, %v4122_v50 }
0x2203   :  { %s5360_s12 = scalar_lea.vmem %s4142_s18, 1408  ;;  %p5365_p3 = scmp.lt.s32.totalorder %s4142_s18, %s4142_s18 }
0x2204   :  { %4131 = vst.msk [vmem:[#allocation2 + $0x50] sm:$0xff] %vm58_vm1, %v4129_v28  ;;  %p5361_p2 = scmp.ne.s32.totalorder %s4142_s18, %s5360_s12  ;;  %p5366_p4 = scmp.lt.s32.totalorder %s5360_s12, %s5360_s12 }
0x2206   :  { %p5367_p5 = por %p5366_p4, %p5365_p3 }
0x2208   :  { %p5368_p6 = pnand %p5367_p5, %p5361_p2 }
0x220a   :  { %5371 = shalt.err (!%p5368_p6)
}
0x220b   :  { %s5372_s30 = scalar_lea.hbm %s6197_s13, 1408 }
0x220c   :  { %p5373_p7 = scmp.ne.s32.totalorder %s6197_s13, %s5372_s30  ;;  %p5376_p8 = scmp.lt.u32.totalorder %s5372_s30, %s6197_s13 }
0x220e   :  { %p5378_p9 = pnand %p5376_p8, %p5373_p7 }
0x2210   :  { %5381 = shalt.err (!%p5378_p9)
}
0x2211   :  { %4147 = dma.vmem_to_hbm [thread:$0]  %s4142_s18, 1408, %s6197_s13, [#allocation3], %s5394_s3, %s5394_s3, %s5395_s26  }
0x2212   :  { %5382 = dma.done.wait [#allocation3], 1408  }
0x2213   :  { %5383 = vsyncadd [#allocation3], 4294965888 }
0x2214   :  { %5384 = dma.done.wait [#allocation5], 2560  }
0x2215   :  { %5385 = vsyncadd [#allocation5], 4294964736 }
0x2216   :  { %4181 = vsyncpa [#allocation3], 1 }
0x2217   :  { %4182 = vsyncpa [#allocation5], 1 }

</bundles_post_ra>
